<compile_context>
chip_gen: v6e
topology: v6e:2x2x1
jax: 0.10.0
libtpu: 0.0.40
codegen_flags: <defaults>
</compile_context>

<pallas_src>
import functools
import numpy as np

import jax
import jax.numpy as jnp
from jax.experimental import pallas as pl
from jax.experimental.pallas import tpu as pltpu

PAD = 0  # Constants.PAD


# ----------------------------------------------------------------------------
# Fully fused encoder-stack Pallas kernel (grid = (batch, layer))
# ----------------------------------------------------------------------------

def _encoder_stack_kernel(x_ref, kbias_ref, npad_ref,
                          wqkv_ref, bqkv_ref, wfc_ref, bfc_ref,
                          ln1g_ref, ln1b_ref,
                          w1_ref, b1_ref, w2_ref, b2_ref,
                          ln2g_ref, ln2b_ref,
                          o_ref, *, n_head, d_k, d_v, inv_temperature):
    layer = pl.program_id(1)

    # Seed the carried activation at layer 0 of each batch row.  The output
    # block's index_map ignores the layer axis, so o_ref stays VMEM resident
    # across all layers of this batch row and only writes back to HBM once.
    @pl.when(layer == 0)
    def _():
        o_ref[0] = x_ref[0]

    x = o_ref[0]                 # (L, D)  f32 carried activation / residual
    kbias = kbias_ref[0]         # (1, L)  additive key-pad bias (0 / -1e30)
    npad = npad_ref[0]           # (L, 1)  f32 non-pad query mask

    # ---- fused Q|K|V projection: bf16 on the MXU, f32 accumulation --------
    qkv = jnp.dot(x.astype(jnp.bfloat16), wqkv_ref[...],
                  preferred_element_type=jnp.float32) + bqkv_ref[...]

    k_off = n_head * d_k
    v_off = 2 * n_head * d_k
    head_outs = []
    for h in range(n_head):      # unrolled; heads stay packed on the lane axis
        qh = qkv[:, h * d_k:(h + 1) * d_k].astype(jnp.bfloat16)
        kh = qkv[:, k_off + h * d_k:k_off + (h + 1) * d_k].astype(jnp.bfloat16)
        vh = qkv[:, v_off + h * d_v:v_off + (h + 1) * d_v].astype(jnp.bfloat16)
        # q @ k^T via dot_general contracting last dims (no explicit transpose)
        s = jax.lax.dot_general(qh, kh, (((1,), (1,)), ((), ())),
                                preferred_element_type=jnp.float32)      # (L, L)
        s = s * inv_temperature + kbias          # (1, L) bias broadcast over rows
        m = jnp.max(s, axis=-1, keepdims=True)
        p = jnp.exp(s - m)
        p = p * pl.reciprocal(jnp.sum(p, axis=-1, keepdims=True), approx=True)
        head_outs.append(jnp.dot(p.astype(jnp.bfloat16), vh,
                                 preferred_element_type=jnp.float32))    # (L, d_v)
    attn = jnp.concatenate(head_outs, axis=-1)                           # (L, H*d_v)

    # ---- output projection + residual + post-LN + non-pad mask (fused) ----
    out = jnp.dot(attn.astype(jnp.bfloat16), wfc_ref[...],
                  preferred_element_type=jnp.float32) + bfc_ref[...]
    y = out + x
    mean = jnp.mean(y, axis=-1, keepdims=True)
    var = jnp.mean(jnp.square(y - mean), axis=-1, keepdims=True)
    y = (y - mean) * jax.lax.rsqrt(var + 1e-5) * ln1g_ref[...] + ln1b_ref[...]
    y = y * npad

    # ---- position-wise FFN + residual + post-LN + non-pad mask ------------
    h1 = jnp.dot(y.astype(jnp.bfloat16), w1_ref[...],
                 preferred_element_type=jnp.float32) + b1_ref[...]
    h1 = jnp.maximum(h1, 0.0)
    z = jnp.dot(h1.astype(jnp.bfloat16), w2_ref[...],
                preferred_element_type=jnp.float32) + b2_ref[...]
    z = z + y
    mean2 = jnp.mean(z, axis=-1, keepdims=True)
    var2 = jnp.mean(jnp.square(z - mean2), axis=-1, keepdims=True)
    z = (z - mean2) * jax.lax.rsqrt(var2 + 1e-5) * ln2g_ref[...] + ln2b_ref[...]
    o_ref[0] = z * npad          # carried to the next layer; HBM writeback at b change


def encoder_stack_pallas(x, key_bias, non_pad, sp, n_head, d_k, d_v):
    """x: (bs, L, D) f32; key_bias: (bs, 1, L) f32; non_pad: (bs, L, 1) f32.

    `sp` holds layer-stacked parameters with a leading n_layers dimension.
    """
    bs, L, D = x.shape
    n_layers, _, qkv_w = sp["w_qkv"].shape
    d_inner = sp["w1"].shape[2]
    kernel = functools.partial(
        _encoder_stack_kernel, n_head=n_head, d_k=d_k, d_v=d_v,
        inv_temperature=float(1.0 / np.sqrt(d_k)))

    per_batch = lambda shape: pl.BlockSpec(shape, lambda b, l: (b, 0, 0))
    # leading layer dim squeezed out; auto-pipeline prefetches next layer's weights
    per_layer = lambda shape: pl.BlockSpec((None,) + shape, lambda b, l: (l, 0, 0))

    return pl.pallas_call(
        kernel,
        out_shape=jax.ShapeDtypeStruct((bs, L, D), jnp.float32),
        grid=(bs, n_layers),
        in_specs=[
            per_batch((1, L, D)),            # x (fetched once per batch row)
            per_batch((1, 1, L)),            # lane-dense additive key-pad bias
            per_batch((1, L, 1)),            # non-pad query mask
            per_layer((D, qkv_w)),           # w_qkv (bf16)
            per_layer((1, qkv_w)),           # b_qkv
            per_layer((n_head * d_v, D)),    # w_fc  (bf16)
            per_layer((1, D)),               # b_fc
            per_layer((1, D)), per_layer((1, D)),   # ln1 gamma / beta
            per_layer((D, d_inner)),         # w1    (bf16)
            per_layer((1, d_inner)),         # b1
            per_layer((d_inner, D)),         # w2    (bf16)
            per_layer((1, D)),               # b2
            per_layer((1, D)), per_layer((1, D)),   # ln2 gamma / beta
        ],
        out_specs=pl.BlockSpec((1, L, D), lambda b, l: (b, 0, 0)),
        compiler_params=pltpu.CompilerParams(
            dimension_semantics=("parallel", "arbitrary"),   # megacore over batch
            vmem_limit_bytes=32 * 1024 * 1024),
    )(x, key_bias, non_pad,
      sp["w_qkv"], sp["b_qkv"], sp["w_fc"], sp["b_fc"], sp["ln1_g"], sp["ln1_b"],
      sp["w1"], sp["b1"], sp["w2"], sp["b2"], sp["ln2_g"], sp["ln2_b"])


# ----------------------------------------------------------------------------
# Masks / embeddings / positional encodings (plain JAX glue)
# ----------------------------------------------------------------------------

def get_non_pad_mask(seq):
    return (seq != PAD).astype(jnp.float32)[..., None]          # (bs, L, 1)


def get_key_pad_bias(seq_k):
    """Lane-dense additive bias (bs, 1, Lk): -1e30 on padded keys, 0 elsewhere."""
    return jnp.where(seq_k == PAD, jnp.float32(-1e30), jnp.float32(0.0))[:, None, :]


def get_sinusoid_encoding_table(n_position, d_hid, padding_idx=None):
    pos = np.arange(n_position, dtype=np.float64)[:, None]
    hid = np.arange(d_hid)[None, :]
    table = pos / np.power(10000, 2 * (hid // 2) / d_hid)
    table[:, 0::2] = np.sin(table[:, 0::2])
    table[:, 1::2] = np.cos(table[:, 1::2])
    if padding_idx is not None:
        table[padding_idx] = 0.0
    return jnp.asarray(table, dtype=jnp.float32)


def _sinusoid_encoding_onfly(pos, d_hid):
    """Matches get_sinusoid_encoding(pos, d_hid) (no zeroing at pos 0)."""
    hid = jnp.arange(d_hid)
    exponent = (2 * (hid // 2)).astype(jnp.float32) / jnp.float32(d_hid)
    inv_freq = jnp.power(jnp.float32(10000.0), -exponent)
    angle = pos[..., None].astype(jnp.float32) * inv_freq
    return jnp.where(hid % 2 == 0, jnp.sin(angle), jnp.cos(angle))


def position_enc_wrapper(pos_table, src_pos, d_word_vec):
    """Branchless equivalent of Encoder.position_enc_wrapper."""
    n_position = pos_table.shape[0]
    exceeded = src_pos >= n_position
    valid = jnp.where(exceeded, 0, src_pos)
    table_emb = pos_table[valid]
    onfly_emb = _sinusoid_encoding_onfly(src_pos, d_word_vec)
    return jnp.where(exceeded[..., None], onfly_emb, table_emb)


# ----------------------------------------------------------------------------
# Encoder forward (Pallas path) + pure-JAX reference for verification
# ----------------------------------------------------------------------------

def encoder_forward(params, cfg, src_seq, src_pos):
    n_head, d_k, d_v = cfg["n_head"], cfg["d_k"], cfg["d_v"]
    key_bias = get_key_pad_bias(src_seq)          # (bs, 1, L) shared by heads/layers
    non_pad = get_non_pad_mask(src_seq)           # (bs, L, 1)
    enc = params["emb"][src_seq] + position_enc_wrapper(
        params["pos_table"], src_pos, cfg["d_word_vec"])
    return encoder_stack_pallas(enc, key_bias, non_pad, params["enc_stack"],
                                n_head, d_k, d_v)


def _ln_ref(y, g, b):
    mean = jnp.mean(y, axis=-1, keepdims=True)
    var = jnp.mean(jnp.square(y - mean), axis=-1, keepdims=True)
    return (y - mean) * jax.lax.rsqrt(var + 1e-5) * g + b


def _encoder_layer_ref(x, key_bias, non_pad, lp, n_head, d_k, d_v):
    inv_t = float(1.0 / np.sqrt(d_k))
    k_off = n_head * d_k
    v_off = 2 * n_head * d_k

    def one(xb, bias, npad):
        qkv = jnp.dot(xb.astype(jnp.bfloat16), lp["w_qkv"],
                      preferred_element_type=jnp.float32) + lp["b_qkv"]
        outs = []
        for h in range(n_head):
            qh = qkv[:, h * d_k:(h + 1) * d_k].astype(jnp.bfloat16)
            kh = qkv[:, k_off + h * d_k:k_off + (h + 1) * d_k].astype(jnp.bfloat16)
            vh = qkv[:, v_off + h * d_v:v_off + (h + 1) * d_v].astype(jnp.bfloat16)
            s = jnp.dot(qh, kh.T, preferred_element_type=jnp.float32) * inv_t + bias
            p = jax.nn.softmax(s, axis=-1)
            outs.append(jnp.dot(p.astype(jnp.bfloat16), vh,
                                preferred_element_type=jnp.float32))
        attn = jnp.concatenate(outs, axis=-1)
        out = jnp.dot(attn.astype(jnp.bfloat16), lp["w_fc"],
                      preferred_element_type=jnp.float32) + lp["b_fc"]
        y = _ln_ref(out + xb, lp["ln1_g"], lp["ln1_b"]) * npad
        h1 = jnp.maximum(jnp.dot(y.astype(jnp.bfloat16), lp["w1"],
                                 preferred_element_type=jnp.float32) + lp["b1"], 0.0)
        z = jnp.dot(h1.astype(jnp.bfloat16), lp["w2"],
                    preferred_element_type=jnp.float32) + lp["b2"]
        return _ln_ref(z + y, lp["ln2_g"], lp["ln2_b"]) * npad

    return jax.vmap(one)(x, key_bias, non_pad)


def encoder_forward_ref(params, cfg, src_seq, src_pos):
    n_head, d_k, d_v = cfg["n_head"], cfg["d_k"], cfg["d_v"]
    key_bias = get_key_pad_bias(src_seq)
    non_pad = get_non_pad_mask(src_seq)
    enc = params["emb"][src_seq] + position_enc_wrapper(
        params["pos_table"], src_pos, cfg["d_word_vec"])
    sp = params["enc_stack"]
    n_layers = sp["w_qkv"].shape[0]
    for l in range(n_layers):
        lp = {k: v[l] for k, v in sp.items()}
        enc = _encoder_layer_ref(enc, key_bias, non_pad, lp, n_head, d_k, d_v)
    return enc


# ----------------------------------------------------------------------------
# Deterministic synthetic parameter init (shapes per module __init__)
# ----------------------------------------------------------------------------

class KeyGen:
    def __init__(self, key):
        self._key = key

    def __call__(self):
        self._key, k = jax.random.split(self._key)
        return k


def init_layer_params(kg, d_model, d_inner, n_head, d_k, d_v):
    def w(shape, s=0.1):
        return s * jax.random.normal(kg(), shape, dtype=jnp.float32)
    w_qs, w_ks, w_vs = w((d_model, n_head * d_k)), w((d_model, n_head * d_k)), w((d_model, n_head * d_v))
    b_qs, b_ks, b_vs = w((n_head * d_k,), 0.02), w((n_head * d_k,), 0.02), w((n_head * d_v,), 0.02)
    return dict(
        # fused Q|K|V weight (one wide lane-dense matmul), stored bf16 for the MXU
        w_qkv=jnp.concatenate([w_qs, w_ks, w_vs], axis=1).astype(jnp.bfloat16),
        b_qkv=jnp.concatenate([b_qs, b_ks, b_vs]).reshape(1, -1),
        w_fc=w((n_head * d_v, d_model)).astype(jnp.bfloat16),
        b_fc=w((d_model,), 0.02).reshape(1, -1),
        ln1_g=jnp.ones((1, d_model), jnp.float32),
        ln1_b=jnp.zeros((1, d_model), jnp.float32),
        w1=w((d_model, d_inner)).astype(jnp.bfloat16),
        b1=w((d_inner,), 0.02).reshape(1, -1),
        w2=w((d_inner, d_model)).astype(jnp.bfloat16),
        b2=w((d_model,), 0.02).reshape(1, -1),
        ln2_g=jnp.ones((1, d_model), jnp.float32),
        ln2_b=jnp.zeros((1, d_model), jnp.float32),
    )


def init_params(seed, cfg):
    kg = KeyGen(jax.random.PRNGKey(seed))
    d_model, d_inner = cfg["d_model"], cfg["d_inner"]
    n_head, d_k, d_v = cfg["n_head"], cfg["d_k"], cfg["d_v"]
    emb = 0.1 * jax.random.normal(kg(), (cfg["n_src_vocab"], d_model), dtype=jnp.float32)
    emb = emb.at[PAD].set(0.0)                       # padding_idx row is zero
    pos_table = get_sinusoid_encoding_table(cfg["len_max_seq"] + 1, cfg["d_word_vec"],
                                            padding_idx=0)
    layers = [init_layer_params(kg, d_model, d_inner, n_head, d_k, d_v)
              for _ in range(cfg["n_layers"])]
    # layer-stacked parameters (leading n_layers dim) for the fused stack kernel
    enc_stack = {k: jnp.stack([lp[k] for lp in layers]) for k in layers[0]}
    return dict(emb=emb, pos_table=pos_table, enc_stack=enc_stack)


# ----------------------------------------------------------------------------

if __name__ == "__main__":
    cfg = dict(n_src_vocab=50, len_max_seq=16, d_word_vec=32, d_model=32,
               d_inner=64, n_layers=2, n_head=4, d_k=8, d_v=8)
    bs, L = 2, 10

    params = init_params(0, cfg)

    key = jax.random.PRNGKey(0)
    src_seq = jax.random.randint(key, (bs, L), 1, cfg["n_src_vocab"], dtype=jnp.int32)
    src_seq = src_seq.at[1, 7:].set(PAD)            # trailing padding on the 2nd example
    src_pos = jnp.where(src_seq != PAD,
                        jnp.arange(1, L + 1, dtype=jnp.int32)[None, :], 0)

    enc_out = encoder_forward(params, cfg, src_seq, src_pos)
    enc_out = jax.block_until_ready(enc_out)

    assert enc_out.shape == (bs, L, cfg["d_model"]), enc_out.shape
    assert bool(jnp.all(jnp.isfinite(enc_out)))

    ref = jax.block_until_ready(encoder_forward_ref(params, cfg, src_seq, src_pos))
    np.testing.assert_allclose(np.asarray(enc_out), np.asarray(ref), rtol=2e-2, atol=2e-2)

    print("KERNEL_OK")
</pallas_src>

<mosaic_0001>
module attributes {stable_mosaic.version = 11 : i64} {
  func.func @_encoder_stack_kernel(%arg0: i32, %arg1: i32, %arg2: memref<1x10x32xf32, #tpu.memory_space<vmem>>, %arg3: memref<1x1x10xf32, #tpu.memory_space<vmem>>, %arg4: memref<1x10x1xf32, #tpu.memory_space<vmem>>, %arg5: memref<1x32x96xbf16, #tpu.memory_space<vmem>>, %arg6: memref<1x1x96xf32, #tpu.memory_space<vmem>>, %arg7: memref<1x32x32xbf16, #tpu.memory_space<vmem>>, %arg8: memref<1x1x32xf32, #tpu.memory_space<vmem>>, %arg9: memref<1x1x32xf32, #tpu.memory_space<vmem>>, %arg10: memref<1x1x32xf32, #tpu.memory_space<vmem>>, %arg11: memref<1x32x64xbf16, #tpu.memory_space<vmem>>, %arg12: memref<1x1x64xf32, #tpu.memory_space<vmem>>, %arg13: memref<1x64x32xbf16, #tpu.memory_space<vmem>>, %arg14: memref<1x1x32xf32, #tpu.memory_space<vmem>>, %arg15: memref<1x1x32xf32, #tpu.memory_space<vmem>>, %arg16: memref<1x1x32xf32, #tpu.memory_space<vmem>>, %arg17: memref<1x10x32xf32, #tpu.memory_space<vmem>>) attributes {dimension_semantics = [#tpu.dimension_semantics<parallel>, #tpu.dimension_semantics<arbitrary>], iteration_bounds = array<i64: 2, 2>, scalar_prefetch = 0 : i64, scratch_operands = 0 : i64, tpu.core_type = #tpu.core_type<tc>, window_params = [{transform_indices = @transform_0, window_bounds = array<i64: 1, 10, 32>}, {transform_indices = @transform_1, window_bounds = array<i64: 1, 1, 10>}, {transform_indices = @transform_2, window_bounds = array<i64: 1, 10, 1>}, {transform_indices = @transform_3, window_bounds = array<i64: 1, 32, 96>}, {transform_indices = @transform_4, window_bounds = array<i64: 1, 1, 96>}, {transform_indices = @transform_5, window_bounds = array<i64: 1, 32, 32>}, {transform_indices = @transform_6, window_bounds = array<i64: 1, 1, 32>}, {transform_indices = @transform_7, window_bounds = array<i64: 1, 1, 32>}, {transform_indices = @transform_8, window_bounds = array<i64: 1, 1, 32>}, {transform_indices = @transform_9, window_bounds = array<i64: 1, 32, 64>}, {transform_indices = @transform_10, window_bounds = array<i64: 1, 1, 64>}, {transform_indices = @transform_11, window_bounds = array<i64: 1, 64, 32>}, {transform_indices = @transform_12, window_bounds = array<i64: 1, 1, 32>}, {transform_indices = @transform_13, window_bounds = array<i64: 1, 1, 32>}, {transform_indices = @transform_14, window_bounds = array<i64: 1, 1, 32>}, {transform_indices = @transform_15, window_bounds = array<i64: 1, 10, 32>}]} {
    %c0_i32 = arith.constant 0 : i32
    %0 = arith.cmpi eq, %arg1, %c0_i32 : i32
    %1 = arith.extui %0 : i1 to i32
    %c0_i32_0 = arith.constant 0 : i32
    %2 = arith.cmpi ne, %1, %c0_i32_0 : i32
    scf.if %2 {
      %c0_82 = arith.constant 0 : index
      %c0_83 = arith.constant 0 : index
      %c0_84 = arith.constant 0 : index
      %197 = vector.load %arg2[%c0_82, %c0_83, %c0_84] : memref<1x10x32xf32, #tpu.memory_space<vmem>>, vector<1x10x32xf32>
      %198 = vector.shape_cast %197 : vector<1x10x32xf32> to vector<10x32xf32>
      %c0_85 = arith.constant 0 : index
      %c0_86 = arith.constant 0 : index
      %c0_87 = arith.constant 0 : index
      %199 = vector.load %arg17[%c0_85, %c0_86, %c0_87] : memref<1x10x32xf32, #tpu.memory_space<vmem>>, vector<1x10x32xf32>
      %200 = vector.shape_cast %199 : vector<1x10x32xf32> to vector<10x32xf32>
      %201 = vector.shape_cast %198 : vector<10x32xf32> to vector<1x10x32xf32>
      tpu.vector_store %arg17[%c0_85, %c0_86, %c0_87], %201 {strides = array<i32>} : memref<1x10x32xf32, #tpu.memory_space<vmem>>, vector<1x10x32xf32>,
    } else {
    }
    %c0 = arith.constant 0 : index
    %c0_1 = arith.constant 0 : index
    %c0_2 = arith.constant 0 : index
    %3 = vector.load %arg17[%c0, %c0_1, %c0_2] : memref<1x10x32xf32, #tpu.memory_space<vmem>>, vector<1x10x32xf32>
    %4 = vector.shape_cast %3 : vector<1x10x32xf32> to vector<10x32xf32>
    %c0_3 = arith.constant 0 : index
    %c0_4 = arith.constant 0 : index
    %c0_5 = arith.constant 0 : index
    %5 = vector.load %arg3[%c0_3, %c0_4, %c0_5] : memref<1x1x10xf32, #tpu.memory_space<vmem>>, vector<1x1x10xf32>
    %6 = vector.shape_cast %5 : vector<1x1x10xf32> to vector<1x10xf32>
    %c0_6 = arith.constant 0 : index
    %c0_7 = arith.constant 0 : index
    %c0_8 = arith.constant 0 : index
    %7 = vector.load %arg4[%c0_6, %c0_7, %c0_8] : memref<1x10x1xf32, #tpu.memory_space<vmem>>, vector<1x10x1xf32>
    %8 = vector.shape_cast %7 : vector<1x10x1xf32> to vector<10x1xf32>
    %9 = arith.truncf %4 : vector<10x32xf32> to vector<10x32xbf16>
    %c0_9 = arith.constant 0 : index
    %c0_10 = arith.constant 0 : index
    %c0_11 = arith.constant 0 : index
    %10 = vector.load %arg5[%c0_9, %c0_10, %c0_11] : memref<1x32x96xbf16, #tpu.memory_space<vmem>>, vector<1x32x96xbf16>
    %11 = vector.shape_cast %10 : vector<1x32x96xbf16> to vector<32x96xbf16>
    %cst = arith.constant dense<0.000000e+00> : vector<10x96xf32>
    %12 = tpu.matmul %9, %11, %cst {dimension_numbers = #tpu.dot_dimension_numbers<[1], [0], [0], [1], [0, 0, 1, 1], [], []>} : vector<10x32xbf16>, vector<32x96xbf16>, vector<10x96xf32> -> vector<10x96xf32>
    %c0_12 = arith.constant 0 : index
    %c0_13 = arith.constant 0 : index
    %c0_14 = arith.constant 0 : index
    %13 = vector.load %arg6[%c0_12, %c0_13, %c0_14] : memref<1x1x96xf32, #tpu.memory_space<vmem>>, vector<1x1x96xf32>
    %14 = vector.shape_cast %13 : vector<1x1x96xf32> to vector<1x96xf32>
    %15 = vector.broadcast %14 : vector<1x96xf32> to vector<10x96xf32>
    %16 = arith.addf %12, %15 : vector<10x96xf32>
    %17 = vector.extract_strided_slice %16 {offsets = [0, 0], sizes = [10, 8], strides = [1, 1]} : vector<10x96xf32> to vector<10x8xf32>
    %18 = arith.truncf %17 : vector<10x8xf32> to vector<10x8xbf16>
    %19 = vector.extract_strided_slice %16 {offsets = [0, 32], sizes = [10, 8], strides = [1, 1]} : vector<10x96xf32> to vector<10x8xf32>
    %20 = arith.truncf %19 : vector<10x8xf32> to vector<10x8xbf16>
    %21 = vector.extract_strided_slice %16 {offsets = [0, 64], sizes = [10, 8], strides = [1, 1]} : vector<10x96xf32> to vector<10x8xf32>
    %22 = arith.truncf %21 : vector<10x8xf32> to vector<10x8xbf16>
    %cst_15 = arith.constant dense<0.000000e+00> : vector<10x10xf32>
    %23 = tpu.matmul %18, %20, %cst_15 {dimension_numbers = #tpu.dot_dimension_numbers<[1], [1], [0], [0], [0, 0, 1, 0], [], []>} : vector<10x8xbf16>, vector<10x8xbf16>, vector<10x10xf32> -> vector<10x10xf32>
    %cst_16 = arith.constant 0.353553385 : f32
    %24 = vector.broadcast %cst_16 : f32 to vector<10x10xf32>
    %25 = arith.mulf %23, %24 : vector<10x10xf32>
    %26 = vector.broadcast %6 : vector<1x10xf32> to vector<10x10xf32>
    %27 = arith.addf %25, %26 : vector<10x10xf32>
    %cst_17 = arith.constant dense<0xFF800000> : vector<10xf32>
    %28 = vector.multi_reduction <maximumf>, %27, %cst_17 [1] : vector<10x10xf32> to vector<10xf32>
    %29 = vector.shape_cast %28 : vector<10xf32> to vector<10x1xf32>
    %30 = vector.broadcast %29 : vector<10x1xf32> to vector<10x10xf32>
    %31 = arith.subf %27, %30 : vector<10x10xf32>
    %32 = math.exp %31 : vector<10x10xf32>
    %cst_18 = arith.constant dense<0.000000e+00> : vector<10xf32>
    %33 = vector.multi_reduction <add>, %32, %cst_18 [1] : vector<10x10xf32> to vector<10xf32>
    %34 = vector.shape_cast %33 : vector<10xf32> to vector<10x1xf32>
    %35 = tpu.reciprocal %34 {approx = true} : vector<10x1xf32> -> vector<10x1xf32>
    %36 = vector.broadcast %35 : vector<10x1xf32> to vector<10x10xf32>
    %37 = arith.mulf %32, %36 : vector<10x10xf32>
    %38 = arith.truncf %37 : vector<10x10xf32> to vector<10x10xbf16>
    %cst_19 = arith.constant dense<0.000000e+00> : vector<10x8xf32>
    %39 = tpu.matmul %38, %22, %cst_19 {dimension_numbers = #tpu.dot_dimension_numbers<[1], [0], [0], [1], [0, 0, 1, 1], [], []>} : vector<10x10xbf16>, vector<10x8xbf16>, vector<10x8xf32> -> vector<10x8xf32>
    %40 = vector.extract_strided_slice %16 {offsets = [0, 8], sizes = [10, 8], strides = [1, 1]} : vector<10x96xf32> to vector<10x8xf32>
    %41 = arith.truncf %40 : vector<10x8xf32> to vector<10x8xbf16>
    %42 = vector.extract_strided_slice %16 {offsets = [0, 40], sizes = [10, 8], strides = [1, 1]} : vector<10x96xf32> to vector<10x8xf32>
    %43 = arith.truncf %42 : vector<10x8xf32> to vector<10x8xbf16>
    %44 = vector.extract_strided_slice %16 {offsets = [0, 72], sizes = [10, 8], strides = [1, 1]} : vector<10x96xf32> to vector<10x8xf32>
    %45 = arith.truncf %44 : vector<10x8xf32> to vector<10x8xbf16>
    %cst_20 = arith.constant dense<0.000000e+00> : vector<10x10xf32>
    %46 = tpu.matmul %41, %43, %cst_20 {dimension_numbers = #tpu.dot_dimension_numbers<[1], [1], [0], [0], [0, 0, 1, 0], [], []>} : vector<10x8xbf16>, vector<10x8xbf16>, vector<10x10xf32> -> vector<10x10xf32>
    %cst_21 = arith.constant 0.353553385 : f32
    %47 = vector.broadcast %cst_21 : f32 to vector<10x10xf32>
    %48 = arith.mulf %46, %47 : vector<10x10xf32>
    %49 = vector.broadcast %6 : vector<1x10xf32> to vector<10x10xf32>
    %50 = arith.addf %48, %49 : vector<10x10xf32>
    %cst_22 = arith.constant dense<0xFF800000> : vector<10xf32>
    %51 = vector.multi_reduction <maximumf>, %50, %cst_22 [1] : vector<10x10xf32> to vector<10xf32>
    %52 = vector.shape_cast %51 : vector<10xf32> to vector<10x1xf32>
    %53 = vector.broadcast %52 : vector<10x1xf32> to vector<10x10xf32>
    %54 = arith.subf %50, %53 : vector<10x10xf32>
    %55 = math.exp %54 : vector<10x10xf32>
    %cst_23 = arith.constant dense<0.000000e+00> : vector<10xf32>
    %56 = vector.multi_reduction <add>, %55, %cst_23 [1] : vector<10x10xf32> to vector<10xf32>
    %57 = vector.shape_cast %56 : vector<10xf32> to vector<10x1xf32>
    %58 = tpu.reciprocal %57 {approx = true} : vector<10x1xf32> -> vector<10x1xf32>
    %59 = vector.broadcast %58 : vector<10x1xf32> to vector<10x10xf32>
    %60 = arith.mulf %55, %59 : vector<10x10xf32>
    %61 = arith.truncf %60 : vector<10x10xf32> to vector<10x10xbf16>
    %cst_24 = arith.constant dense<0.000000e+00> : vector<10x8xf32>
    %62 = tpu.matmul %61, %45, %cst_24 {dimension_numbers = #tpu.dot_dimension_numbers<[1], [0], [0], [1], [0, 0, 1, 1], [], []>} : vector<10x10xbf16>, vector<10x8xbf16>, vector<10x8xf32> -> vector<10x8xf32>
    %63 = vector.extract_strided_slice %16 {offsets = [0, 16], sizes = [10, 8], strides = [1, 1]} : vector<10x96xf32> to vector<10x8xf32>
    %64 = arith.truncf %63 : vector<10x8xf32> to vector<10x8xbf16>
    %65 = vector.extract_strided_slice %16 {offsets = [0, 48], sizes = [10, 8], strides = [1, 1]} : vector<10x96xf32> to vector<10x8xf32>
    %66 = arith.truncf %65 : vector<10x8xf32> to vector<10x8xbf16>
    %67 = vector.extract_strided_slice %16 {offsets = [0, 80], sizes = [10, 8], strides = [1, 1]} : vector<10x96xf32> to vector<10x8xf32>
    %68 = arith.truncf %67 : vector<10x8xf32> to vector<10x8xbf16>
    %cst_25 = arith.constant dense<0.000000e+00> : vector<10x10xf32>
    %69 = tpu.matmul %64, %66, %cst_25 {dimension_numbers = #tpu.dot_dimension_numbers<[1], [1], [0], [0], [0, 0, 1, 0], [], []>} : vector<10x8xbf16>, vector<10x8xbf16>, vector<10x10xf32> -> vector<10x10xf32>
    %cst_26 = arith.constant 0.353553385 : f32
    %70 = vector.broadcast %cst_26 : f32 to vector<10x10xf32>
    %71 = arith.mulf %69, %70 : vector<10x10xf32>
    %72 = vector.broadcast %6 : vector<1x10xf32> to vector<10x10xf32>
    %73 = arith.addf %71, %72 : vector<10x10xf32>
    %cst_27 = arith.constant dense<0xFF800000> : vector<10xf32>
    %74 = vector.multi_reduction <maximumf>, %73, %cst_27 [1] : vector<10x10xf32> to vector<10xf32>
    %75 = vector.shape_cast %74 : vector<10xf32> to vector<10x1xf32>
    %76 = vector.broadcast %75 : vector<10x1xf32> to vector<10x10xf32>
    %77 = arith.subf %73, %76 : vector<10x10xf32>
    %78 = math.exp %77 : vector<10x10xf32>
    %cst_28 = arith.constant dense<0.000000e+00> : vector<10xf32>
    %79 = vector.multi_reduction <add>, %78, %cst_28 [1] : vector<10x10xf32> to vector<10xf32>
    %80 = vector.shape_cast %79 : vector<10xf32> to vector<10x1xf32>
    %81 = tpu.reciprocal %80 {approx = true} : vector<10x1xf32> -> vector<10x1xf32>
    %82 = vector.broadcast %81 : vector<10x1xf32> to vector<10x10xf32>
    %83 = arith.mulf %78, %82 : vector<10x10xf32>
    %84 = arith.truncf %83 : vector<10x10xf32> to vector<10x10xbf16>
    %cst_29 = arith.constant dense<0.000000e+00> : vector<10x8xf32>
    %85 = tpu.matmul %84, %68, %cst_29 {dimension_numbers = #tpu.dot_dimension_numbers<[1], [0], [0], [1], [0, 0, 1, 1], [], []>} : vector<10x10xbf16>, vector<10x8xbf16>, vector<10x8xf32> -> vector<10x8xf32>
    %86 = vector.extract_strided_slice %16 {offsets = [0, 24], sizes = [10, 8], strides = [1, 1]} : vector<10x96xf32> to vector<10x8xf32>
    %87 = arith.truncf %86 : vector<10x8xf32> to vector<10x8xbf16>
    %88 = vector.extract_strided_slice %16 {offsets = [0, 56], sizes = [10, 8], strides = [1, 1]} : vector<10x96xf32> to vector<10x8xf32>
    %89 = arith.truncf %88 : vector<10x8xf32> to vector<10x8xbf16>
    %90 = vector.extract_strided_slice %16 {offsets = [0, 88], sizes = [10, 8], strides = [1, 1]} : vector<10x96xf32> to vector<10x8xf32>
    %91 = arith.truncf %90 : vector<10x8xf32> to vector<10x8xbf16>
    %cst_30 = arith.constant dense<0.000000e+00> : vector<10x10xf32>
    %92 = tpu.matmul %87, %89, %cst_30 {dimension_numbers = #tpu.dot_dimension_numbers<[1], [1], [0], [0], [0, 0, 1, 0], [], []>} : vector<10x8xbf16>, vector<10x8xbf16>, vector<10x10xf32> -> vector<10x10xf32>
    %cst_31 = arith.constant 0.353553385 : f32
    %93 = vector.broadcast %cst_31 : f32 to vector<10x10xf32>
    %94 = arith.mulf %92, %93 : vector<10x10xf32>
    %95 = vector.broadcast %6 : vector<1x10xf32> to vector<10x10xf32>
    %96 = arith.addf %94, %95 : vector<10x10xf32>
    %cst_32 = arith.constant dense<0xFF800000> : vector<10xf32>
    %97 = vector.multi_reduction <maximumf>, %96, %cst_32 [1] : vector<10x10xf32> to vector<10xf32>
    %98 = vector.shape_cast %97 : vector<10xf32> to vector<10x1xf32>
    %99 = vector.broadcast %98 : vector<10x1xf32> to vector<10x10xf32>
    %100 = arith.subf %96, %99 : vector<10x10xf32>
    %101 = math.exp %100 : vector<10x10xf32>
    %cst_33 = arith.constant dense<0.000000e+00> : vector<10xf32>
    %102 = vector.multi_reduction <add>, %101, %cst_33 [1] : vector<10x10xf32> to vector<10xf32>
    %103 = vector.shape_cast %102 : vector<10xf32> to vector<10x1xf32>
    %104 = tpu.reciprocal %103 {approx = true} : vector<10x1xf32> -> vector<10x1xf32>
    %105 = vector.broadcast %104 : vector<10x1xf32> to vector<10x10xf32>
    %106 = arith.mulf %101, %105 : vector<10x10xf32>
    %107 = arith.truncf %106 : vector<10x10xf32> to vector<10x10xbf16>
    %cst_34 = arith.constant dense<0.000000e+00> : vector<10x8xf32>
    %108 = tpu.matmul %107, %91, %cst_34 {dimension_numbers = #tpu.dot_dimension_numbers<[1], [0], [0], [1], [0, 0, 1, 1], [], []>} : vector<10x10xbf16>, vector<10x8xbf16>, vector<10x8xf32> -> vector<10x8xf32>
    %109 = tpu.concatenate %39, %62, %85, %108 in 1 : vector<10x8xf32>, vector<10x8xf32>, vector<10x8xf32>, vector<10x8xf32> -> vector<10x32xf32>
    %110 = arith.truncf %109 : vector<10x32xf32> to vector<10x32xbf16>
    %c0_35 = arith.constant 0 : index
    %c0_36 = arith.constant 0 : index
    %c0_37 = arith.constant 0 : index
    %111 = vector.load %arg7[%c0_35, %c0_36, %c0_37] : memref<1x32x32xbf16, #tpu.memory_space<vmem>>, vector<1x32x32xbf16>
    %112 = vector.shape_cast %111 : vector<1x32x32xbf16> to vector<32x32xbf16>
    %cst_38 = arith.constant dense<0.000000e+00> : vector<10x32xf32>
    %113 = tpu.matmul %110, %112, %cst_38 {dimension_numbers = #tpu.dot_dimension_numbers<[1], [0], [0], [1], [0, 0, 1, 1], [], []>} : vector<10x32xbf16>, vector<32x32xbf16>, vector<10x32xf32> -> vector<10x32xf32>
    %c0_39 = arith.constant 0 : index
    %c0_40 = arith.constant 0 : index
    %c0_41 = arith.constant 0 : index
    %114 = vector.load %arg8[%c0_39, %c0_40, %c0_41] : memref<1x1x32xf32, #tpu.memory_space<vmem>>, vector<1x1x32xf32>
    %115 = vector.shape_cast %114 : vector<1x1x32xf32> to vector<1x32xf32>
    %116 = vector.broadcast %115 : vector<1x32xf32> to vector<10x32xf32>
    %117 = arith.addf %113, %116 : vector<10x32xf32>
    %118 = arith.addf %117, %4 : vector<10x32xf32>
    %cst_42 = arith.constant dense<0.000000e+00> : vector<10xf32>
    %119 = vector.multi_reduction <add>, %118, %cst_42 [1] : vector<10x32xf32> to vector<10xf32>
    %120 = vector.shape_cast %119 : vector<10xf32> to vector<10x1xf32>
    %cst_43 = arith.constant 3.200000e+01 : f32
    %121 = vector.broadcast %cst_43 : f32 to vector<10x1xf32>
    %122 = arith.divf %120, %121 : vector<10x1xf32>
    %123 = vector.broadcast %122 : vector<10x1xf32> to vector<10x32xf32>
    %124 = arith.subf %118, %123 : vector<10x32xf32>
    %125 = arith.mulf %124, %124 : vector<10x32xf32>
    %cst_44 = arith.constant dense<0.000000e+00> : vector<10xf32>
    %126 = vector.multi_reduction <add>, %125, %cst_44 [1] : vector<10x32xf32> to vector<10xf32>
    %127 = vector.shape_cast %126 : vector<10xf32> to vector<10x1xf32>
    %cst_45 = arith.constant 3.200000e+01 : f32
    %128 = vector.broadcast %cst_45 : f32 to vector<10x1xf32>
    %129 = arith.divf %127, %128 : vector<10x1xf32>
    %130 = vector.broadcast %122 : vector<10x1xf32> to vector<10x32xf32>
    %131 = arith.subf %118, %130 : vector<10x32xf32>
    %cst_46 = arith.constant 9.99999974E-6 : f32
    %132 = vector.broadcast %cst_46 : f32 to vector<10x1xf32>
    %133 = arith.addf %129, %132 : vector<10x1xf32>
    %134 = math.rsqrt %133 : vector<10x1xf32>
    %135 = vector.broadcast %134 : vector<10x1xf32> to vector<10x32xf32>
    %136 = arith.mulf %131, %135 : vector<10x32xf32>
    %c0_47 = arith.constant 0 : index
    %c0_48 = arith.constant 0 : index
    %c0_49 = arith.constant 0 : index
    %137 = vector.load %arg9[%c0_47, %c0_48, %c0_49] : memref<1x1x32xf32, #tpu.memory_space<vmem>>, vector<1x1x32xf32>
    %138 = vector.shape_cast %137 : vector<1x1x32xf32> to vector<1x32xf32>
    %139 = vector.broadcast %138 : vector<1x32xf32> to vector<10x32xf32>
    %140 = arith.mulf %136, %139 : vector<10x32xf32>
    %c0_50 = arith.constant 0 : index
    %c0_51 = arith.constant 0 : index
    %c0_52 = arith.constant 0 : index
    %141 = vector.load %arg10[%c0_50, %c0_51, %c0_52] : memref<1x1x32xf32, #tpu.memory_space<vmem>>, vector<1x1x32xf32>
    %142 = vector.shape_cast %141 : vector<1x1x32xf32> to vector<1x32xf32>
    %143 = vector.broadcast %142 : vector<1x32xf32> to vector<10x32xf32>
    %144 = arith.addf %140, %143 : vector<10x32xf32>
    %145 = vector.broadcast %8 : vector<10x1xf32> to vector<10x32xf32>
    %146 = arith.mulf %144, %145 : vector<10x32xf32>
    %147 = arith.truncf %146 : vector<10x32xf32> to vector<10x32xbf16>
    %c0_53 = arith.constant 0 : index
    %c0_54 = arith.constant 0 : index
    %c0_55 = arith.constant 0 : index
    %148 = vector.load %arg11[%c0_53, %c0_54, %c0_55] : memref<1x32x64xbf16, #tpu.memory_space<vmem>>, vector<1x32x64xbf16>
    %149 = vector.shape_cast %148 : vector<1x32x64xbf16> to vector<32x64xbf16>
    %cst_56 = arith.constant dense<0.000000e+00> : vector<10x64xf32>
    %150 = tpu.matmul %147, %149, %cst_56 {dimension_numbers = #tpu.dot_dimension_numbers<[1], [0], [0], [1], [0, 0, 1, 1], [], []>} : vector<10x32xbf16>, vector<32x64xbf16>, vector<10x64xf32> -> vector<10x64xf32>
    %c0_57 = arith.constant 0 : index
    %c0_58 = arith.constant 0 : index
    %c0_59 = arith.constant 0 : index
    %151 = vector.load %arg12[%c0_57, %c0_58, %c0_59] : memref<1x1x64xf32, #tpu.memory_space<vmem>>, vector<1x1x64xf32>
    %152 = vector.shape_cast %151 : vector<1x1x64xf32> to vector<1x64xf32>
    %153 = vector.broadcast %152 : vector<1x64xf32> to vector<10x64xf32>
    %154 = arith.addf %150, %153 : vector<10x64xf32>
    %cst_60 = arith.constant 0.000000e+00 : f32
    %155 = vector.broadcast %cst_60 : f32 to vector<10x64xf32>
    %156 = arith.maximumf %154, %155 : vector<10x64xf32>
    %157 = arith.truncf %156 : vector<10x64xf32> to vector<10x64xbf16>
    %c0_61 = arith.constant 0 : index
    %c0_62 = arith.constant 0 : index
    %c0_63 = arith.constant 0 : index
    %158 = vector.load %arg13[%c0_61, %c0_62, %c0_63] : memref<1x64x32xbf16, #tpu.memory_space<vmem>>, vector<1x64x32xbf16>
    %159 = vector.shape_cast %158 : vector<1x64x32xbf16> to vector<64x32xbf16>
    %cst_64 = arith.constant dense<0.000000e+00> : vector<10x32xf32>
    %160 = tpu.matmul %157, %159, %cst_64 {dimension_numbers = #tpu.dot_dimension_numbers<[1], [0], [0], [1], [0, 0, 1, 1], [], []>} : vector<10x64xbf16>, vector<64x32xbf16>, vector<10x32xf32> -> vector<10x32xf32>
    %c0_65 = arith.constant 0 : index
    %c0_66 = arith.constant 0 : index
    %c0_67 = arith.constant 0 : index
    %161 = vector.load %arg14[%c0_65, %c0_66, %c0_67] : memref<1x1x32xf32, #tpu.memory_space<vmem>>, vector<1x1x32xf32>
    %162 = vector.shape_cast %161 : vector<1x1x32xf32> to vector<1x32xf32>
    %163 = vector.broadcast %162 : vector<1x32xf32> to vector<10x32xf32>
    %164 = arith.addf %160, %163 : vector<10x32xf32>
    %165 = arith.addf %164, %146 : vector<10x32xf32>
    %cst_68 = arith.constant dense<0.000000e+00> : vector<10xf32>
    %166 = vector.multi_reduction <add>, %165, %cst_68 [1] : vector<10x32xf32> to vector<10xf32>
    %167 = vector.shape_cast %166 : vector<10xf32> to vector<10x1xf32>
    %cst_69 = arith.constant 3.200000e+01 : f32
    %168 = vector.broadcast %cst_69 : f32 to vector<10x1xf32>
    %169 = arith.divf %167, %168 : vector<10x1xf32>
    %170 = vector.broadcast %169 : vector<10x1xf32> to vector<10x32xf32>
    %171 = arith.subf %165, %170 : vector<10x32xf32>
    %172 = arith.mulf %171, %171 : vector<10x32xf32>
    %cst_70 = arith.constant dense<0.000000e+00> : vector<10xf32>
    %173 = vector.multi_reduction <add>, %172, %cst_70 [1] : vector<10x32xf32> to vector<10xf32>
    %174 = vector.shape_cast %173 : vector<10xf32> to vector<10x1xf32>
    %cst_71 = arith.constant 3.200000e+01 : f32
    %175 = vector.broadcast %cst_71 : f32 to vector<10x1xf32>
    %176 = arith.divf %174, %175 : vector<10x1xf32>
    %177 = vector.broadcast %169 : vector<10x1xf32> to vector<10x32xf32>
    %178 = arith.subf %165, %177 : vector<10x32xf32>
    %cst_72 = arith.constant 9.99999974E-6 : f32
    %179 = vector.broadcast %cst_72 : f32 to vector<10x1xf32>
    %180 = arith.addf %176, %179 : vector<10x1xf32>
    %181 = math.rsqrt %180 : vector<10x1xf32>
    %182 = vector.broadcast %181 : vector<10x1xf32> to vector<10x32xf32>
    %183 = arith.mulf %178, %182 : vector<10x32xf32>
    %c0_73 = arith.constant 0 : index
    %c0_74 = arith.constant 0 : index
    %c0_75 = arith.constant 0 : index
    %184 = vector.load %arg15[%c0_73, %c0_74, %c0_75] : memref<1x1x32xf32, #tpu.memory_space<vmem>>, vector<1x1x32xf32>
    %185 = vector.shape_cast %184 : vector<1x1x32xf32> to vector<1x32xf32>
    %186 = vector.broadcast %185 : vector<1x32xf32> to vector<10x32xf32>
    %187 = arith.mulf %183, %186 : vector<10x32xf32>
    %c0_76 = arith.constant 0 : index
    %c0_77 = arith.constant 0 : index
    %c0_78 = arith.constant 0 : index
    %188 = vector.load %arg16[%c0_76, %c0_77, %c0_78] : memref<1x1x32xf32, #tpu.memory_space<vmem>>, vector<1x1x32xf32>
    %189 = vector.shape_cast %188 : vector<1x1x32xf32> to vector<1x32xf32>
    %190 = vector.broadcast %189 : vector<1x32xf32> to vector<10x32xf32>
    %191 = arith.addf %187, %190 : vector<10x32xf32>
    %192 = vector.broadcast %8 : vector<10x1xf32> to vector<10x32xf32>
    %193 = arith.mulf %191, %192 : vector<10x32xf32>
    %c0_79 = arith.constant 0 : index
    %c0_80 = arith.constant 0 : index
    %c0_81 = arith.constant 0 : index
    %194 = vector.load %arg17[%c0_79, %c0_80, %c0_81] : memref<1x10x32xf32, #tpu.memory_space<vmem>>, vector<1x10x32xf32>
    %195 = vector.shape_cast %194 : vector<1x10x32xf32> to vector<10x32xf32>
    %196 = vector.shape_cast %193 : vector<10x32xf32> to vector<1x10x32xf32>
    tpu.vector_store %arg17[%c0_79, %c0_80, %c0_81], %196 {strides = array<i32>} : memref<1x10x32xf32, #tpu.memory_space<vmem>>, vector<1x10x32xf32>,
    return
  }
  func.func @transform_0(%arg0: i32, %arg1: i32) -> (i32, i32, i32) {
    %c0_i32 = arith.constant 0 : i32
    %c0_i32_0 = arith.constant 0 : i32
    %c0_i32_1 = arith.constant 0 : i32
    return %arg0, %c0_i32, %c0_i32_0 : i32, i32, i32
  }
  func.func @transform_1(%arg0: i32, %arg1: i32) -> (i32, i32, i32) {
    %c0_i32 = arith.constant 0 : i32
    %c0_i32_0 = arith.constant 0 : i32
    %c0_i32_1 = arith.constant 0 : i32
    return %arg0, %c0_i32, %c0_i32_0 : i32, i32, i32
  }
  func.func @transform_2(%arg0: i32, %arg1: i32) -> (i32, i32, i32) {
    %c0_i32 = arith.constant 0 : i32
    %c0_i32_0 = arith.constant 0 : i32
    %c0_i32_1 = arith.constant 0 : i32
    return %arg0, %c0_i32, %c0_i32_0 : i32, i32, i32
  }
  func.func @transform_3(%arg0: i32, %arg1: i32) -> (i32, i32, i32) {
    %c0_i32 = arith.constant 0 : i32
    %c0_i32_0 = arith.constant 0 : i32
    %c0_i32_1 = arith.constant 0 : i32
    return %arg1, %c0_i32, %c0_i32_0 : i32, i32, i32
  }
  func.func @transform_4(%arg0: i32, %arg1: i32) -> (i32, i32, i32) {
    %c0_i32 = arith.constant 0 : i32
    %c0_i32_0 = arith.constant 0 : i32
    %c0_i32_1 = arith.constant 0 : i32
    return %arg1, %c0_i32, %c0_i32_0 : i32, i32, i32
  }
  func.func @transform_5(%arg0: i32, %arg1: i32) -> (i32, i32, i32) {
    %c0_i32 = arith.constant 0 : i32
    %c0_i32_0 = arith.constant 0 : i32
    %c0_i32_1 = arith.constant 0 : i32
    return %arg1, %c0_i32, %c0_i32_0 : i32, i32, i32
  }
  func.func @transform_6(%arg0: i32, %arg1: i32) -> (i32, i32, i32) {
    %c0_i32 = arith.constant 0 : i32
    %c0_i32_0 = arith.constant 0 : i32
    %c0_i32_1 = arith.constant 0 : i32
    return %arg1, %c0_i32, %c0_i32_0 : i32, i32, i32
  }
  func.func @transform_7(%arg0: i32, %arg1: i32) -> (i32, i32, i32) {
    %c0_i32 = arith.constant 0 : i32
    %c0_i32_0 = arith.constant 0 : i32
    %c0_i32_1 = arith.constant 0 : i32
    return %arg1, %c0_i32, %c0_i32_0 : i32, i32, i32
  }
  func.func @transform_8(%arg0: i32, %arg1: i32) -> (i32, i32, i32) {
    %c0_i32 = arith.constant 0 : i32
    %c0_i32_0 = arith.constant 0 : i32
    %c0_i32_1 = arith.constant 0 : i32
    return %arg1, %c0_i32, %c0_i32_0 : i32, i32, i32
  }
  func.func @transform_9(%arg0: i32, %arg1: i32) -> (i32, i32, i32) {
    %c0_i32 = arith.constant 0 : i32
    %c0_i32_0 = arith.constant 0 : i32
    %c0_i32_1 = arith.constant 0 : i32
    return %arg1, %c0_i32, %c0_i32_0 : i32, i32, i32
  }
  func.func @transform_10(%arg0: i32, %arg1: i32) -> (i32, i32, i32) {
    %c0_i32 = arith.constant 0 : i32
    %c0_i32_0 = arith.constant 0 : i32
    %c0_i32_1 = arith.constant 0 : i32
    return %arg1, %c0_i32, %c0_i32_0 : i32, i32, i32
  }
  func.func @transform_11(%arg0: i32, %arg1: i32) -> (i32, i32, i32) {
    %c0_i32 = arith.constant 0 : i32
    %c0_i32_0 = arith.constant 0 : i32
    %c0_i32_1 = arith.constant 0 : i32
    return %arg1, %c0_i32, %c0_i32_0 : i32, i32, i32
  }
  func.func @transform_12(%arg0: i32, %arg1: i32) -> (i32, i32, i32) {
    %c0_i32 = arith.constant 0 : i32
    %c0_i32_0 = arith.constant 0 : i32
    %c0_i32_1 = arith.constant 0 : i32
    return %arg1, %c0_i32, %c0_i32_0 : i32, i32, i32
  }
  func.func @transform_13(%arg0: i32, %arg1: i32) -> (i32, i32, i32) {
    %c0_i32 = arith.constant 0 : i32
    %c0_i32_0 = arith.constant 0 : i32
    %c0_i32_1 = arith.constant 0 : i32
    return %arg1, %c0_i32, %c0_i32_0 : i32, i32, i32
  }
  func.func @transform_14(%arg0: i32, %arg1: i32) -> (i32, i32, i32) {
    %c0_i32 = arith.constant 0 : i32
    %c0_i32_0 = arith.constant 0 : i32
    %c0_i32_1 = arith.constant 0 : i32
    return %arg1, %c0_i32, %c0_i32_0 : i32, i32, i32
  }
  func.func @transform_15(%arg0: i32, %arg1: i32) -> (i32, i32, i32) {
    %c0_i32 = arith.constant 0 : i32
    %c0_i32_0 = arith.constant 0 : i32
    %c0_i32_1 = arith.constant 0 : i32
    return %arg0, %c0_i32, %c0_i32_0 : i32, i32, i32
  }
}

</mosaic_0001>

<bundles_post_ra>
// kernel: tpu_custom_call.1
= control target key start
LH: loop header
LB: loop body
LE: loop exit
PB: predicated region body
PF: predicated region fallthrough
CT: control target
= control target key end

     0   :  { %s2343_s18 = smov 0   ;;  %s2345_s19 = smov 0   ;;  %s2667_s0 = inlined_call_operand.vmem [shape: f32[2,10,32], index: 0, kind: input, shape index: {}]   ;;  %s2668_s1 = inlined_call_operand.vmem [shape: f32[2,1,10], index: 1, kind: input, shape index: {}]   ;;  %s2669_s2 = inlined_call_operand.vmem [shape: f32[2,10,1], index: 2, kind: input, shape index: {}]   ;;  %s2670_s3 = inlined_call_operand.vmem [shape: bf16[2,32,96], index: 3, kind: input, shape index: {}]   ;;  %s2671_s4 = inlined_call_operand.vmem [shape: f32[2,1,96], index: 4, kind: input, shape index: {}]   ;;  %s2672_s5 = inlined_call_operand.vmem [shape: bf16[2,32,32], index: 5, kind: input, shape index: {}]   ;;  %s2673_s6 = inlined_call_operand.vmem [shape: f32[2,1,32], index: 6, kind: input, shape index: {}]   ;;  %s2674_s7 = inlined_call_operand.vmem [shape: f32[2,1,32], index: 7, kind: input, shape index: {}]   ;;  %s2675_s8 = inlined_call_operand.vmem [shape: f32[2,1,32], index: 8, kind: input, shape index: {}]   ;;  %s2676_s9 = inlined_call_operand.vmem [shape: bf16[2,32,64], index: 9, kind: input, shape index: {}]   ;;  %s2677_s10 = inlined_call_operand.vmem [shape: f32[2,1,64], index: 10, kind: input, shape index: {}]   ;;  %s2678_s11 = inlined_call_operand.vmem [shape: bf16[2,64,32], index: 11, kind: input, shape index: {}]   ;;  %s2679_s12 = inlined_call_operand.vmem [shape: f32[2,1,32], index: 12, kind: input, shape index: {}]   ;;  %s2680_s13 = inlined_call_operand.vmem [shape: f32[2,1,32], index: 13, kind: input, shape index: {}]   ;;  %s2681_s14 = inlined_call_operand.vmem [shape: f32[2,1,32], index: 14, kind: input, shape index: {}]   ;;  %s2682_s15 = inlined_call_operand.vmem [shape: f32[2,10,32], index: 15, kind: output, shape index: {}]  }
   0x1   :  { %2688 = sst [smem:[#allocation9_spill]] %s2667_s0  ;;  %s2347_s20 = smov 0  }
   0x2   :  { %2689 = sst [smem:[#allocation10_spill]] %s2668_s1  ;;  %s2349_s21 = smov 0  }
   0x3   :  { %2690 = sst [smem:[#allocation11_spill]] %s2669_s2  ;;  %s2351_s22 = smov 0  }
   0x4   :  { %2691 = sst [smem:[#allocation12_spill]] %s2670_s3 }
   0x5   :  { %2692 = sst [smem:[#allocation13_spill]] %s2672_s5 }
   0x6   :  { %2693 = sst [smem:[#allocation14_spill]] %s2675_s8 }
   0x7   :  { %2694 = sst [smem:[#allocation15_spill]] %s2676_s9 }
   0x8   :  { %2695 = sst [smem:[#allocation16_spill]] %s2677_s10 }
   0x9   :  { %2696 = sst [smem:[#allocation17_spill]] %s2680_s13 }
   0xa   :  { %2697 = sst [smem:[#allocation18_spill]] %s2681_s14 }
   0xb   :  { %2698 = sst [smem:[#allocation19_spill]] %s2682_s15 }
   0xc LB: > { %2699 = sst [smem:[#allocation2_spill]] %s2228_s18  ;;  %s34_s23 = sadd.s32 1, %s2236_s20  ;;  %s2244_s22 = sphi %s2351_s22, %s25_s22   ;;  %s2240_s21 = sphi %s2349_s21, %s2734_s21   ;;  %s2236_s20 = sphi %s2347_s20, %s2733_s20   ;;  %s2232_s19 = sphi %s2345_s19, %s2732_s19   ;;  %s2228_s18 = sphi %s2343_s18, %s2731_s18  }
   0xd   : > { %2700 = sst [smem:[#allocation3_spill]] %s2236_s20  ;;  %s37_s24 = sadd.s32 1, %s2240_s21 }
   0xe   : > { %2701 = sst [smem:[#allocation4_spill]] %s2240_s21  ;;  %p35_p0 = scmp.ge.s32.totalorder %s34_s23, 2 }
   0xf   : > { %2702 = sst [smem:[#allocation5_spill]] %s2244_s22  ;;  %p1912_p1 = scmp.ge.s32.totalorder %s2244_s22, 1 }
  0x10   : > { %p571_p2 = scmp.lt.s32.totalorder %s2244_s22, 5  ;;  %s2736_s23 = smov (%p35_p0, %s34_s23), 0 }
  0x11   : > { %2703 = sst [smem:[#allocation6_spill]] %s2736_s23  ;;  %s2738_s24 = smov (!%p35_p0, %s37_s24), %s2240_s21 }
  0x12   : > { %p572_p3 = pnand %p1912_p1, %p571_p2  ;;  %p39_p4 = scmp.ge.s32.totalorder %s2738_s24, 2 }
  0x14   : > { %s2740_s24 = smov (%p39_p4, %s2738_s24), 0  ;;  %575 = sbr.rel (%p572_p3) target bundleno = 2513 (0x9d1), region = 80 }
  0x15   : > { %2704 = sst [smem:[#allocation7_spill]] %s2740_s24 }
  0x19   : > { %p671_p5 = scmp.lt.s32.totalorder %s2232_s19, 1  ;;  %p684_p6 = scmp.lt.s32.totalorder %s2228_s18, 1 }
  0x1a   : > { %s2706_s0 = sld [smem:[#allocation9_spill]] }
  0x1b   : > { %s2742_s19 = smov (!%p671_p5, %s2232_s19), 1  ;;  %s2707_s2 = sld [smem:[#allocation11_spill]] }
  0x1c   : > { %s2379_s25 = scalar_select %p684_p6, %s2228_s18, 1 }
  0x1d   : > { %s1961_s26 = sshll.u32 %s2742_s19, 4  ;;  %s2709_s3 = sld [smem:[#allocation12_spill]] }
  0x1e   : > { %s1963_s20 = sshll.u32 %s2379_s25, 4  ;;  %s2710_s5 = sld [smem:[#allocation13_spill]] }
  0x1f   : > { %s2712_s9 = sld [smem:[#allocation15_spill]]  ;;  %s721_s1 = scalar_lea.vmem %s2679_s12, %s2379_s25 }
  0x20   : > { %s675_s17 = scalar_lea.vmem %s2706_s0, %s1961_s26  ;;  %s2717_s0 = sld [smem:[#allocation2_spill]] }
  0x21   : > { %s2392_s21 = scalar_lea.vmem %s2707_s2, %s1961_s26 }
  0x22   : > { %2708 = sst [smem:[#allocation8_spill]] %s2392_s21 }
  0x23   : > { %s688_s27 = scalar_lea.vmem %s2709_s3, %s1963_s20  ;;  %s2714_s21 = sld [smem:[#allocation17_spill]] }
  0x24   : > { %s2405_s30 = scalar_lea.vmem %s2710_s5, %s1963_s20  ;;  %s1966_s5 = sshll.u32 %s2379_s25, 5 }
  0x25   : > { %s2422_s14 = scalar_lea.vmem %s2712_s9, %s1963_s20  ;;  %s2432_s23 = scalar_lea.vmem %s2678_s11, %s1966_s5 }
  0x26   : > { %s2715_s9 = sld [smem:[#allocation18_spill]]  ;;  %p1927_p7 = scmp.ne.s32.totalorder %s2717_s0, 0 }
  0x27   : > { %s2716_s3 = sld [smem:[#allocation19_spill]] }
  0x29   : > { %s724_s15 = scalar_lea.vmem %s2714_s21, %s2379_s25  ;;  %737 = sbr.rel (%p1927_p7) target bundleno = 49 (0x31), region = 84 }
  0x2c   : > { %s727_s8 = scalar_lea.vmem %s2715_s9, %s2379_s25 }
  0x2d   : > { %s2449_s10 = scalar_lea.vmem %s2716_s3, %s1961_s26 }
  0x2e   : > { %v738_v0 = vld [vmem:[%s675_s17] sm:$0xff]  ;;  %vm740_vm0 = vcmask 261120   ;;  %v739_v1 = vld [vmem:[%s675_s17 + $0x8] sm:$0x3]  ;;  %vm742_vm1 = vcmask 254976  }
  0x2f   : > { %741 = vst.msk [vmem:[%s2449_s10] sm:$0xff] %vm740_vm0, %v738_v0 }
  0x30   : > { %743 = vst.msk [vmem:[%s2449_s10 + $0x8] sm:$0x3] %vm742_vm1, %v739_v1 }
  0x31 PF: > { %v2156_v2 = vld [vmem:[%s688_s27 + $0x8] sm:$0xff]   ;;  %v2246_v3 = vmov 0.0   ;;  %v2157_v4 = vld [vmem:[%s688_s27] sm:$0xff]   ;;  %vm2247_vm2 = vmmov 0   ;;  %vm773_vm3 = vcmask 261120   ;;  %s2718_s9 = scalar_lea.vmem %s2671_s4, %s2379_s25  ;;  %s2248_s21 = smov 120  }
  0x32   : > { %1998 = vmatprep.subr.bf16.mxu0 %v2246_v3  ;;  %2006 = vmatprep.subr.bf16.mxu1 %v2246_v3  ;;  %v1928_v9 = vld [vmem:[%s2718_s9] ss:$0 sm:$0xff]  ;;  %s2249_s26 = smov 96   ;;  %s2250_s17 = smov 80   ;;  %vm822_vm4 = vcmask 64512   ;;  %vm880_vm5 = vcmask 80896  }
  0x33   : > { %1999 = vmatpush3.bf16.msra.mxu0 %v2156_v2  ;;  %2002 = vmatprep.mubr.msk.bf16.mxu0 %vm2247_vm2, %v2246_v3  ;;  %s2251_s27 = smov 88   ;;  %s2252_s22 = smov 72   ;;  %vm884_vm6 = vcmask 74752   ;;  %vm910_vm7 = vcmask 1044480   ;;  %vm1362_vm8 = vcmask 130048   ;;  %vm1365_vm9 = vcmask 195584  }
  0x34   : > { %2000 = vmatprep.subr.bf16.mxu0 %v2246_v3  ;;  %2008 = vmatprep.mubr.msk.bf16.mxu1 %vm2247_vm2, %v2246_v3  ;;  %s2253_s16 = smov 112   ;;  %s2254_s2 = smov 104   ;;  %vm1441_vm10 = vcmask 254976   ;;  %vm1606_vm11 = vcmask 523264  }
  0x35   : > { %s2719_s20 = sld [smem:[#allocation10_spill]]  ;;  %s2256_s29 = smov 64  }
  0x36   : > { %v2459_v5 = vld [vmem:[%s2449_s10] sm:$0xff]  ;;  %s2257_s28 = smov 48   ;;  %s2258_s0 = smov 40  }
  0x37   : > { %v2462_v6 = vld [vmem:[%s2449_s10 + $0x8] sm:$0x3]  ;;  %2001 = vmatpush3.bf16.msra.mxu0 %v2157_v4  ;;  %s2259_s3 = smov 8   ;;  %s2260_s5 = smov 16  }
  0x38   : > { %v749_v7 = vpack.c.bf16 %v2462_v6, %v2459_v5  ;;  %2012 = vmatprep.subr.bf16.mxu0 %v2246_v3  ;;  %s2261_s9 = smov 24   ;;  %s2724_s24 = sld [smem:[#allocation14_spill]] }
  0x3a   : > { %2003 = vmatmul.mubr.msk.bf16.vlgmr.msra.gmra.mxu0 %vm773_vm3, %v749_v7 }
  0x3b   : > { %2014 = vmatprep.mubr.msk.bf16.mxu0 %vm2247_vm2, %v2246_v3  ;;  %s2720_s13 = scalar_lea.vmem %s2719_s20, %s2742_s19  ;;  %s2255_s19 = smov 56  }
  0x3c   : > { %v1933_v28 = vld [vmem:[%s2720_s13] ss:$0 sm:$0xff] }
  0x3e   : > { %s2725_s18 = scalar_lea.vmem %s2724_s24, %s2379_s25 }
  0xfa   : > { %v811_v8 = vpop.f32.mrf.mxu0 }
  0xfb   : > { %v812_v12 = vadd.f32 %v1928_v9, %v811_v8 }
  0xfc   : > { %v2004_v10 = vpop.f32.mrf.mxu0 }
  0xfe   : > { %v814_v11 = vpop.f32.mrf.mxu0 }
  0xff   : > { %v815_v13 = vadd.f32 %v1928_v9, %v814_v11 }
 0x100   : > { %v2005_v14 = vpop.f32.mrf.mxu0 }
 0x101   : > { %v2478_v15 = vpack.c.bf16 %v815_v13, %v812_v12 }
 0x103   : > { %955 = vrot.lane.b32.xlu1 %v2478_v15, %s2248_s21  ;;  %820 = vrot.lane.b32.xlu0 %v2478_v15, %s2249_s26 }
 0x107   : > { %1084 = vrot.lane.b32.xlu1 %v2478_v15, %s2250_s17  ;;  %957 = vrot.lane.b32.xlu0 %v2478_v15, %s2251_s27  ;;  %s2722_s17 = scalar_lea.vmem %s2673_s6, %s2379_s25 }
 0x10b   : > { %1211 = vrot.lane.b32.xlu1 %v2478_v15, %s2252_s22  ;;  %1082 = vrot.lane.b32.xlu0 %v2478_v15, %s2253_s16  ;;  %s2723_s16 = scalar_lea.vmem %s2674_s7, %s2379_s25 }
 0x10f   : > { %1209 = vrot.lane.b32.xlu0 %v2478_v15, %s2254_s2 }
 0x175   : > { %v821_v16 = vpop.permute.xlu0 %820  ;;  %v956_v19 = vpop.permute.xlu1 %955 }
 0x176   : > { %v827_v17 = vsel %vm822_vm4, %v821_v16, 0 }
 0x177   : > { %2007 = vmatpush3.bf16.xpose.msra.mxu1 %v827_v17 }
 0x178   : > { %2018 = vmatprep.subr.bf16.mxu1 %v2246_v3 }
 0x179   : > { %v958_v18 = vpop.permute.xlu0 %957  ;;  %v1085_v21 = vpop.permute.xlu1 %1084 }
 0x17a   : > { %v963_v20 = vsel %vm822_vm4, %v958_v18, 0  ;;  %v1090_v22 = vsel %vm822_vm4, %v1085_v21, 0 }
 0x17d   : > { %v1212_v23 = vpop.permute.xlu1 %1211  ;;  %v1083_v24 = vpop.permute.xlu0 %1082 }
 0x17e   : > { %2009 = vmatmul.mubr.msk.bf16.vlgmr.msra.gmra.mxu1 %vm822_vm4, %v2478_v15  ;;  %v1217_v25 = vsel %vm822_vm4, %v1212_v23, 0 }
 0x17f   : > { %2019 = vmatpush3.bf16.xpose.msra.mxu1 %v963_v20  ;;  %2020 = vmatprep.mubr.msk.bf16.mxu1 %vm2247_vm2, %v2246_v3 }
 0x180   : > { %2030 = vmatprep.subr.bf16.mxu1 %v2246_v3 }
 0x181   : > { %v1210_v26 = vpop.permute.xlu0 %1209 }
 0x186   : > { %2021 = vmatmul.mubr.msk.bf16.vlgmr.msra.gmra.mxu1 %vm822_vm4, %v956_v19 }
 0x187   : > { %2031 = vmatpush3.bf16.xpose.msra.mxu1 %v1090_v22  ;;  %2032 = vmatprep.mubr.msk.bf16.mxu1 %vm2247_vm2, %v2246_v3 }
 0x188   : > { %2042 = vmatprep.subr.bf16.mxu1 %v2246_v3 }
 0x18e   : > { %2033 = vmatmul.mubr.msk.bf16.vlgmr.msra.gmra.mxu1 %vm822_vm4, %v1083_v24 }
 0x18f   : > { %2043 = vmatpush3.bf16.xpose.msra.mxu1 %v1217_v25  ;;  %2044 = vmatprep.mubr.msk.bf16.mxu1 %vm2247_vm2, %v2246_v3 }
 0x190   : > { %2054 = vmatprep.subr.bf16.mxu1 %v2246_v3 }
 0x196   : > { %2045 = vmatmul.mubr.msk.bf16.vlgmr.msra.gmra.mxu1 %vm822_vm4, %v1210_v26 }
 0x197   : > { %2058 = vmatprep.mubr.msk.bf16.mxu1 %vm2247_vm2, %v2246_v3 }
 0x23e   : > { %v863_v27 = vpop.f32.mrf.mxu1 }
 0x23f   : > { %v870_v29 = vmul.f32 0.35355338, %v863_v27 }
 0x240   : > { %v2010_v30 = vpop.f32.mrf.mxu1 }
 0x241   : > { %v878_v31 = vadd.f32 %v1933_v28, %v870_v29 }
 0x242   : > { %v866_v32 = vpop.f32.mrf.mxu1 }
 0x243   : > { %v871_v33 = vmul.f32 0.35355338, %v866_v32  ;;  %v881_v34 = vsel %vm880_vm5, %v878_v31, -inf }
 0x244   : > { %882 = vmax.xlane.f32.xlu1 %v881_v34  ;;  %v2011_v35 = vpop.f32.mrf.mxu1 }
 0x245   : > { %v879_v36 = vadd.f32 %v1933_v28, %v871_v33 }
 0x246   : > { %v999_v37 = vpop.f32.mrf.mxu1 }
 0x247   : > { %v1006_v38 = vmul.f32 0.35355338, %v999_v37  ;;  %v885_v39 = vsel %vm884_vm6, %v879_v36, -inf }
 0x248   : > { %886 = vmax.xlane.f32.xlu0 %v885_v39  ;;  %v2022_v40 = vpop.f32.mrf.mxu1 }
 0x249   : > { %v1008_v41 = vadd.f32 %v1933_v28, %v1006_v38 }
 0x24a   : > { %v1002_v42 = vpop.f32.mrf.mxu1 }
 0x24b   : > { %v1007_v43 = vmul.f32 0.35355338, %v1002_v42  ;;  %v1010_v44 = vsel %vm880_vm5, %v1008_v41, -inf }
 0x24c   : > { %1011 = vmax.xlane.f32.xlu0 %v1010_v44  ;;  %v2023_v45 = vpop.f32.mrf.mxu1 }
 0x24d   : > { %v1009_v46 = vadd.f32 %v1933_v28, %v1007_v43 }
 0x24e   : > { %v1126_v47 = vpop.f32.mrf.mxu1 }
 0x24f   : > { %v1133_v48 = vmul.f32 0.35355338, %v1126_v47  ;;  %v1013_v49 = vsel %vm884_vm6, %v1009_v46, -inf }
 0x250   : > { %1014 = vmax.xlane.f32.xlu1 %v1013_v49  ;;  %v2034_v50 = vpop.f32.mrf.mxu1 }
 0x251   : > { %v1135_v51 = vadd.f32 %v1933_v28, %v1133_v48 }
 0x252   : > { %v1129_v52 = vpop.f32.mrf.mxu1 }
 0x253   : > { %v1134_v53 = vmul.f32 0.35355338, %v1129_v52  ;;  %v1137_v54 = vsel %vm880_vm5, %v1135_v51, -inf }
 0x254   : > { %1138 = vmax.xlane.f32.xlu0 %v1137_v54  ;;  %v2035_v55 = vpop.f32.mrf.mxu1 }
 0x255   : > { %v1136_v56 = vadd.f32 %v1933_v28, %v1134_v53 }
 0x256   : > { %v1253_v57 = vpop.f32.mrf.mxu1 }
 0x257   : > { %v1260_v58 = vmul.f32 0.35355338, %v1253_v57  ;;  %v1140_v59 = vsel %vm884_vm6, %v1136_v56, -inf }
 0x258   : > { %1141 = vmax.xlane.f32.xlu1 %v1140_v59  ;;  %v2046_v60 = vpop.f32.mrf.mxu1 }
 0x259   : > { %v1262_v61 = vadd.f32 %v1933_v28, %v1260_v58 }
 0x25a   : > { %v1256_v62 = vpop.f32.mrf.mxu1 }
 0x25b   : > { %v1261_v63 = vmul.f32 0.35355338, %v1256_v62  ;;  %v1264_v0 = vsel %vm880_vm5, %v1262_v61, -inf }
 0x25c   : > { %1265 = vmax.xlane.f32.xlu0 %v1264_v0  ;;  %v2047_v1 = vpop.f32.mrf.mxu1 }
 0x25d   : > { %v1263_v2 = vadd.f32 %v1933_v28, %v1261_v63 }
 0x25f   : > { %v1267_v4 = vsel %vm884_vm6, %v1263_v2, -inf }
 0x260   : > { %1268 = vmax.xlane.f32.xlu1 %v1267_v4 }
 0x2cd   : > { %v883_v7 = vpop.xlane.xlu1 %882 }
 0x2ce   : > { %v888_v8 = vsub.f32 %v878_v31, %v883_v7 }
 0x2d0   : > { %v890_v9 = vmul.f32 1.442695, %v888_v8 }
 0x2d1   : > { %v887_v10 = vpop.xlane.xlu0 %886 }
 0x2d2   : > { %2166 = vpow2.f32 %v890_v9  ;;  %v889_v11 = vsub.f32 %v879_v36, %v887_v10 }
 0x2d4   : > { %v892_v12 = vmul.f32 1.442695, %v889_v11 }
 0x2d5   : > { %v1012_v13 = vpop.xlane.xlu0 %1011 }
 0x2d6   : > { %2168 = vpow2.f32 %v892_v12  ;;  %v1016_v14 = vsub.f32 %v1008_v41, %v1012_v13 }
 0x2d8   : > { %v1018_v16 = vmul.f32 1.442695, %v1016_v14 }
 0x2d9   : > { %v1015_v23 = vpop.xlane.xlu1 %1014 }
 0x2da   : > { %2170 = vpow2.f32 %v1018_v16  ;;  %v1017_v24 = vsub.f32 %v1009_v46, %v1015_v23 }
 0x2dc   : > { %v1020_v28 = vmul.f32 1.442695, %v1017_v24 }
 0x2dd   : > { %v1139_v25 = vpop.xlane.xlu0 %1138 }
 0x2de   : > { %v1143_v27 = vsub.f32 %v1135_v51, %v1139_v25  ;;  %2172 = vpow2.f32 %v1020_v28 }
 0x2df   : > { %v2521_v17 = vpop.eup %2166 }
 0x2e0   : > { %v894_v18 = vsel %vm880_vm5, %v2521_v17, 0.0  ;;  %v1145_v32 = vmul.f32 1.442695, %v1143_v27 }
 0x2e1   : > { %895 = vadd.xlane.f32.xlu0 %v894_v18  ;;  %v1142_v26 = vpop.xlane.xlu1 %1141 }
 0x2e2   : > { %v1144_v29 = vsub.f32 %v1136_v56, %v1142_v26  ;;  %2174 = vpow2.f32 %v1145_v32 }
 0x2e3   : > { %v2169_v19 = vpop.eup %2168 }
 0x2e4   : > { %v897_v20 = vsel %vm884_vm6, %v2169_v19, 0.0  ;;  %v1147_v34 = vmul.f32 1.442695, %v1144_v29 }
 0x2e5   : > { %898 = vadd.xlane.f32.xlu1 %v897_v20  ;;  %v1266_v30 = vpop.xlane.xlu0 %1265 }
 0x2e6   : > { %v1270_v33 = vsub.f32 %v1262_v61, %v1266_v30  ;;  %2176 = vpow2.f32 %v1147_v34  ;;  %v2158_v30 = vld [vmem:[%s2405_s30 + $0x8] sm:$0xff]  }
 0x2e7   : > { %v2526_v21 = vpop.eup %2170  ;;  %2055 = vmatpush3.bf16.msra.mxu1 %v2158_v30 }
 0x2e8   : > { %v1022_v22 = vsel %vm880_vm5, %v2526_v21, 0.0  ;;  %v1272_v36 = vmul.f32 1.442695, %v1270_v33  ;;  %2056 = vmatprep.subr.bf16.mxu1 %v2246_v3 }
 0x2e9   : > { %1023 = vadd.xlane.f32.xlu0 %v1022_v22  ;;  %v1269_v31 = vpop.xlane.xlu1 %1268 }
 0x2ea   : > { %v1271_v35 = vsub.f32 %v1263_v2, %v1269_v31  ;;  %2178 = vpow2.f32 %v1272_v36 }
 0x2eb   : > { %v2173_v38 = vpop.eup %2172 }
 0x2ec   : > { %v1274_v37 = vmul.f32 1.442695, %v1271_v35  ;;  %v1025_v40 = vsel %vm884_vm6, %v2173_v38, 0.0  ;;  %v2159_v35 = vld [vmem:[%s2405_s30] sm:$0xff]   ;;  %s2721_s30 = sld [smem:[#allocation8_spill]] }
 0x2ed   : > { %2057 = vmatpush3.bf16.msra.mxu1 %v2159_v35  ;;  %v1946_v35 = vld [vmem:[%s2725_s18] ss:$0 sm:$0xff] }
 0x2ee   : > { %2180 = vpow2.f32 %v1274_v37  ;;  %2070 = vmatprep.subr.bf16.mxu1 %v2246_v3 }
 0x2ef   : > { %v2532_v39 = vpop.eup %2174 }
 0x2f0   : > { %v1149_v44 = vsel %vm880_vm5, %v2532_v39, 0.0 }
 0x2f3   : > { %v2177_v41 = vpop.eup %2176 }
 0x2f4   : > { %v1152_v43 = vsel %vm884_vm6, %v2177_v41, 0.0 }
 0x2f6   : > { %1033 = vrot.lane.b32.xlu1 %v2478_v15, %s2255_s19  ;;  %s2726_s19 = sld [smem:[#allocation16_spill]] }
 0x2f7   : > { %v2535_v42 = vpop.eup %2178 }
 0x2f8   : > { %v1276_v47 = vsel %vm880_vm5, %v2535_v42, 0.0 }
 0x2fb   : > { %v2540_v45 = vpop.eup %2180 }
 0x2fc   : > { %v1279_v46 = vsel %vm884_vm6, %v2540_v45, 0.0 }
 0x2ff   : > { %905 = vrot.lane.b32.xlu0 %v2478_v15, %s2256_s29  ;;  %s2727_s29 = scalar_lea.vmem %s2726_s19, %s2379_s25 }
 0x31a   : > { %1026 = vadd.xlane.f32.xlu1 %v1025_v40 }
 0x31e   : > { %1153 = vadd.xlane.f32.xlu1 %v1152_v43  ;;  %1150 = vadd.xlane.f32.xlu0 %v1149_v44 }
 0x322   : > { %1280 = vadd.xlane.f32.xlu1 %v1279_v46  ;;  %1277 = vadd.xlane.f32.xlu0 %v1276_v47 }
 0x333   : > { %1160 = vrot.lane.b32.xlu1 %v2478_v15, %s2257_s28 }
 0x338   : > { %1287 = vrot.lane.b32.xlu0 %v2478_v15, %s2258_s0 }
 0x36a   : > { %v896_v48 = vpop.xlane.xlu0 %895 }
 0x36b   : > { %2182 = vrcp.f32 %v896_v48 }
 0x36e   : > { %v899_v49 = vpop.xlane.xlu1 %898 }
 0x36f   : > { %2184 = vrcp.f32 %v899_v49 }
 0x372   : > { %v1024_v50 = vpop.xlane.xlu0 %1023  ;;  %v1034_v57 = vpop.permute.xlu1 %1033 }
 0x373   : > { %v1039_v15 = vsel %vm910_vm7, %v1034_v57, 0  ;;  %2186 = vrcp.f32 %v1024_v50 }
 0x376   : > { %v906_v51 = vpop.permute.xlu0 %905 }
 0x377   : > { %v912_v52 = vsel %vm910_vm7, %v906_v51, 0 }
 0x378   : > { %2013 = vmatpush3.bf16.msra.mxu0 %v912_v52  ;;  %v2183_v53 = vpop.eup %2182 }
 0x379   : > { %2024 = vmatprep.subr.bf16.mxu0 %v2246_v3  ;;  %v902_v55 = vmul.f32 %v2183_v53, %v2521_v17 }
 0x37c   : > { %v2185_v54 = vpop.eup %2184 }
 0x37d   : > { %v903_v56 = vmul.f32 %v2185_v54, %v2169_v19 }
 0x37f   : > { %v904_v58 = vpack.c.bf16 %v903_v56, %v902_v55 }
 0x380   : > { %v2187_v0 = vpop.eup %2186 }
 0x381   : > { %2015 = vmatmul.mubr.msk.bf16.vlgmr.msra.gmra.mxu0 %vm880_vm5, %v904_v58  ;;  %v1030_v2 = vmul.f32 %v2187_v0, %v2526_v21 }
 0x382   : > { %2025 = vmatpush3.bf16.msra.mxu0 %v1039_v15  ;;  %2026 = vmatprep.mubr.msk.bf16.mxu0 %vm2247_vm2, %v2246_v3 }
 0x383   : > { %2036 = vmatprep.subr.bf16.mxu0 %v2246_v3 }
 0x3a3   : > { %v1027_v59 = vpop.xlane.xlu1 %1026 }
 0x3a4   : > { %2188 = vrcp.f32 %v1027_v59  ;;  %v1941_v59 = vld [vmem:[%s2722_s17] ss:$0 sm:$0xff] }
 0x3a7   : > { %v1154_v60 = vpop.xlane.xlu1 %1153  ;;  %v1151_v61 = vpop.xlane.xlu0 %1150 }
 0x3a8   : > { %2190 = vrcp.f32 %v1154_v60 }
 0x3a9   : > { %2192 = vrcp.f32 %v1151_v61 }
 0x3ab   : > { %v1281_v62 = vpop.xlane.xlu1 %1280  ;;  %v1278_v63 = vpop.xlane.xlu0 %1277 }
 0x3ac   : > { %2194 = vrcp.f32 %v1281_v62 }
 0x3ad   : > { %2196 = vrcp.f32 %v1278_v63 }
 0x3af   : > { %v1161_v7 = vpop.permute.xlu1 %1160  ;;  %v1288_v14 = vpop.permute.xlu0 %1287 }
 0x3b0   : > { %v1166_v11 = vsel %vm910_vm7, %v1161_v7, 0  ;;  %v1293_v19 = vsel %vm910_vm7, %v1288_v14, 0 }
 0x3b1   : > { %v2189_v1 = vpop.eup %2188 }
 0x3b2   : > { %v1031_v4 = vmul.f32 %v2189_v1, %v2173_v38 }
 0x3b4   : > { %v1032_v8 = vpack.c.bf16 %v1031_v4, %v1030_v2 }
 0x3b5   : > { %v2191_v9 = vpop.eup %2190 }
 0x3b6   : > { %v2193_v10 = vpop.eup %2192  ;;  %2027 = vmatmul.mubr.msk.bf16.vlgmr.msra.gmra.mxu0 %vm880_vm5, %v1032_v8  ;;  %v1158_v13 = vmul.f32 %v2191_v9, %v2177_v41  ;;  %v747_v9 = vld [vmem:[%s2721_s30] sm:$0xff] }
 0x3b7   : > { %2037 = vmatpush3.bf16.msra.mxu0 %v1166_v11  ;;  %2038 = vmatprep.mubr.msk.bf16.mxu0 %vm2247_vm2, %v2246_v3  ;;  %v1157_v12 = vmul.f32 %v2193_v10, %v2532_v39  ;;  %v2262_v10 = vmov 0  }
 0x3b8   : > { %2048 = vmatprep.subr.bf16.mxu0 %v2246_v3  ;;  %2154 = vset.pattern.permute.xlu1 %v2262_v10 }
 0x3b9   : > { %v2195_v16 = vpop.eup %2194  ;;  %v1159_v17 = vpack.c.bf16 %v1158_v13, %v1157_v12  ;;  %2155 = vset.pattern.permute.xlu0 %v2262_v10 }
 0x3ba   : > { %v2197_v18 = vpop.eup %2196  ;;  %v1285_v21 = vmul.f32 %v2195_v16, %v2540_v45 }
 0x3bb   : > { %v1284_v20 = vmul.f32 %v2197_v18, %v2535_v42 }
 0x3bd   : > { %v1286_v22 = vpack.c.bf16 %v1285_v21, %v1284_v20  ;;  %v748_v20 = vld [vmem:[%s2721_s30 + $0x8] sm:$0x3] }
 0x3be   : > { %2039 = vmatmul.mubr.msk.bf16.vlgmr.msra.gmra.mxu0 %vm880_vm5, %v1159_v17  ;;  %v2160_v21 = vld [vmem:[%s2422_s14 + $0x8] sm:$0xff]  }
 0x3bf   : > { %2049 = vmatpush3.bf16.msra.mxu0 %v1293_v19  ;;  %2050 = vmatprep.mubr.msk.bf16.mxu0 %vm2247_vm2, %v2246_v3 }
 0x3c0   : > { %2062 = vmatprep.subr.bf16.mxu0 %v2246_v3 }
 0x3c6   : > { %2051 = vmatmul.mubr.msk.bf16.vlgmr.msra.gmra.mxu0 %vm880_vm5, %v1286_v22  ;;  %v2161_v22 = vld [vmem:[%s2422_s14] sm:$0xff]  }
 0x3c7   : > { %2066 = vmatprep.mubr.msk.bf16.mxu0 %vm2247_vm2, %v2246_v3  ;;  %2063 = vmatpush3.bf16.msra.mxu0 %v2160_v21 }
 0x3c8   : > { %2064 = vmatprep.subr.bf16.mxu0 %v2246_v3 }
 0x3cb   : > { %2065 = vmatpush3.bf16.msra.mxu0 %v2161_v22  ;;  %v1957_v22 = vld [vmem:[%s724_s15] ss:$0 sm:$0xff] }
 0x441   : > { %v948_v23 = vpop.f32.mrf.mxu0 }
 0x443   : > { %v2016_v24 = vpop.f32.mrf.mxu0 }
 0x445   : > { %v951_v25 = vpop.f32.mrf.mxu0 }
 0x447   : > { %v2017_v26 = vpop.f32.mrf.mxu0 }
 0x476   : > { %v1075_v27 = vpop.f32.mrf.mxu0 }
 0x478   : > { %v2028_v28 = vpop.f32.mrf.mxu0 }
 0x47a   : > { %v1078_v29 = vpop.f32.mrf.mxu0 }
 0x47b   : > { %v2139_v31 = vpack.i.bf16 %v1078_v29, %v1075_v27 }
 0x47c   : > { %v2029_v32 = vpop.f32.mrf.mxu0 }
 0x47d   : > { %2140 = vrot.lane.b32.xlu1 %v2139_v31, %s2259_s3  ;;  %v1945_v31 = vld [vmem:[%s2723_s16] ss:$0 sm:$0xff] }
 0x47e   : > { %v1202_v33 = vpop.f32.mrf.mxu0 }
 0x480   : > { %v2040_v34 = vpop.f32.mrf.mxu0 }
 0x482   : > { %v1205_v36 = vpop.f32.mrf.mxu0 }
 0x483   : > { %v2144_v37 = vpack.i.bf16 %v1205_v36, %v1202_v33 }
 0x484   : > { %v2041_v38 = vpop.f32.mrf.mxu0 }
 0x485   : > { %2145 = vrot.lane.b32.xlu0 %v2144_v37, %s2260_s5 }
 0x486   : > { %v1329_v39 = vpop.f32.mrf.mxu0 }
 0x488   : > { %v2052_v40 = vpop.f32.mrf.mxu0 }
 0x48a   : > { %v1332_v41 = vpop.f32.mrf.mxu0 }
 0x48b   : > { %v2149_v42 = vpack.i.bf16 %v1332_v41, %v1329_v39 }
 0x48c   : > { %v2053_v43 = vpop.f32.mrf.mxu0 }
 0x48d   : > { %2150 = vrot.lane.b32.xlu1 %v2149_v42, %s2261_s9 }
 0x4ef   : > { %v2141_v44 = vpop.permute.xlu1 %2140 }
 0x4f0   : > { %v2143_v46 = vunpack.i.h.bf16 %v2141_v44  ;;  %v2142_v47 = vunpack.i.l.bf16 %v2141_v44 }
 0x4f2   : > { %v1361_v51 = vsel %vm822_vm4, %v951_v25, %v2143_v46  ;;  %v1360_v52 = vsel %vm822_vm4, %v948_v23, %v2142_v47  ;;  %v2162_v23 = vld [vmem:[%s2432_s23 + $0x18] sm:$0xff]   ;;  %v2164_v46 = vld [vmem:[%s2432_s23 + $0x8] sm:$0xff]   ;;  %v2165_v47 = vld [vmem:[%s2432_s23] sm:$0xff]  }
 0x4f7   : > { %v2146_v45 = vpop.permute.xlu0 %2145 }
 0x4f8   : > { %v2148_v48 = vunpack.i.h.bf16 %v2146_v45  ;;  %v2147_v49 = vunpack.i.l.bf16 %v2146_v45  ;;  %v2163_v45 = vld [vmem:[%s2432_s23 + $0x10] sm:$0xff]  }
 0x4fa   : > { %v1364_v55 = vsel %vm1362_vm8, %v1361_v51, %v2148_v48  ;;  %v1363_v56 = vsel %vm1362_vm8, %v1360_v52, %v2147_v49  ;;  %v1947_v48 = vld [vmem:[%s2727_s29] ss:$0 sm:$0xff] }
 0x4ff   : > { %v2151_v50 = vpop.permute.xlu1 %2150 }
 0x500   : > { %v2153_v53 = vunpack.i.h.bf16 %v2151_v50  ;;  %v2152_v54 = vunpack.i.l.bf16 %v2151_v50 }
 0x502   : > { %v1367_v57 = vsel %vm1365_vm9, %v1364_v55, %v2153_v53  ;;  %v1366_v58 = vsel %vm1365_vm9, %v1363_v56, %v2152_v54 }
 0x503   : > { %v1368_v15 = vpack.c.bf16 %v1367_v57, %v1366_v58 }
 0x505   : > { %2059 = vmatmul.mubr.msk.bf16.vlgmr.msra.gmra.mxu1 %vm773_vm3, %v1368_v15 }
 0x506   : > { %2078 = vmatprep.mubr.msk.bf16.mxu1 %vm2247_vm2, %v2246_v3  ;;  %2071 = vmatpush3.bf16.msra.mxu1 %v2162_v23 }
 0x507   : > { %2072 = vmatprep.subr.bf16.mxu1 %v2246_v3 }
 0x50a   : > { %2073 = vmatpush3.bf16.msra.mxu1 %v2163_v45 }
 0x50b   : > { %2074 = vmatprep.subr.bf16.mxu1 %v2246_v3 }
 0x50e   : > { %2075 = vmatpush3.bf16.msra.mxu1 %v2164_v46 }
 0x50f   : > { %2076 = vmatprep.subr.bf16.mxu1 %v2246_v3  ;;  %v1951_v3 = vld [vmem:[%s721_s1] ss:$0 sm:$0xff] }
 0x512   : > { %2077 = vmatpush3.bf16.msra.mxu1 %v2165_v47 }
 0x5c5   : > { %v1429_v60 = vpop.f32.mrf.mxu1 }
 0x5c6   : > { %v1430_v61 = vadd.f32 %v1941_v59, %v1429_v60 }
 0x5c7   : > { %v2060_v62 = vpop.f32.mrf.mxu1 }
 0x5c8   : > { %v1436_v63 = vadd.f32 %v1430_v61, %v2459_v5 }
 0x5c9   : > { %v1432_v0 = vpop.f32.mrf.mxu1 }
 0x5ca   : > { %v1433_v1 = vadd.f32 %v1941_v59, %v1432_v0  ;;  %v1438_v2 = vsel %vm773_vm3, %v1436_v63, 0.0 }
 0x5cb   : > { %1439 = vadd.xlane.f32.xlu0 %v1438_v2  ;;  %v2061_v4 = vpop.f32.mrf.mxu1 }
 0x5cc   : > { %v1437_v7 = vadd.f32 %v1433_v1, %v2462_v6 }
 0x5ce   : > { %v1442_v8 = vsel %vm1441_vm10, %v1437_v7, 0.0 }
 0x5cf   : > { %1443 = vadd.xlane.f32.xlu1 %v1442_v8 }
 0x5e0   : > { %1486 = vperm.xlu1 %2154, %v747_v9  }
 0x654   : > { %v1440_v5 = vpop.xlane.xlu0 %1439 }
 0x655   : > { %v1446_v11 = vmul.f32 0.03125, %v1440_v5 }
 0x657   : > { %v1448_v12 = vsub.f32 %v1436_v63, %v1446_v11 }
 0x658   : > { %v1444_v13 = vpop.xlane.xlu1 %1443 }
 0x659   : > { %v1447_v14 = vmul.f32 0.03125, %v1444_v13  ;;  %v1450_v16 = vmul.f32 %v1448_v12, %v1448_v12 }
 0x65b   : > { %v1449_v17 = vsub.f32 %v1437_v7, %v1447_v14  ;;  %v1452_v6 = vsel %vm773_vm3, %v1450_v16, 0.0 }
 0x65c   : > { %1453 = vadd.xlane.f32.xlu0 %v1452_v6  ;;  %v2610_v39 = vpop.permute.xlu1 %1486 }
 0x65d   : > { %v1451_v18 = vmul.f32 %v1449_v17, %v1449_v17 }
 0x65f   : > { %v1455_v19 = vsel %vm1441_vm10, %v1451_v18, 0.0 }
 0x660   : > { %1456 = vadd.xlane.f32.xlu0 %v1455_v19 }
 0x676   : > { %1491 = vperm.xlu0 %2155, %v748_v20  }
 0x6e5   : > { %v1454_v24 = vpop.xlane.xlu0 %1453 }
 0x6e6   : > { %v1458_v25 = vmul.f32 0.03125, %v1454_v24  ;;  %v1958_v24 = vld [vmem:[%s727_s8] ss:$0 sm:$0xff] }
 0x6e8   : > { %v1460_v26 = vadd.f32 1e-05, %v1458_v25 }
 0x6e9   : > { %v1457_v27 = vpop.xlane.xlu0 %1456 }
 0x6ea   : > { %2198 = vrsqrt.f32 %v1460_v26  ;;  %v1459_v28 = vmul.f32 0.03125, %v1457_v27 }
 0x6ec   : > { %v1461_v29 = vadd.f32 1e-05, %v1459_v28 }
 0x6ee   : > { %2200 = vrsqrt.f32 %v1461_v29 }
 0x6f1   : > { %v2612_v40 = vpop.permute.xlu0 %1491 }
 0x6f7   : > { %v2199_v30 = vpop.eup %2198 }
 0x6f8   : > { %v1464_v32 = vmul.f32 %v2199_v30, %v1448_v12 }
 0x6fa   : > { %v1473_v33 = vmul.f32 %v1945_v31, %v1464_v32 }
 0x6fb   : > { %v2201_v34 = vpop.eup %2200 }
 0x6fc   : > { %v1465_v36 = vmul.f32 %v2201_v34, %v1449_v17  ;;  %v1482_v37 = vadd.f32 %v1946_v35, %v1473_v33 }
 0x6fe   : > { %v1474_v38 = vmul.f32 %v1945_v31, %v1465_v36  ;;  %v1494_v42 = vmul.f32 %v2610_v39, %v1482_v37 }
 0x700   : > { %v1483_v41 = vadd.f32 %v1946_v35, %v1474_v38 }
 0x702   : > { %v1495_v43 = vmul.f32 %v2612_v40, %v1483_v41 }
 0x704   : > { %v1496_v44 = vpack.c.bf16 %v1495_v43, %v1494_v42 }
 0x706   : > { %2067 = vmatmul.mubr.msk.bf16.vlgmr.msra.gmra.mxu0 %vm773_vm3, %v1496_v44 }
 0x7c6   : > { %v1557_v49 = vpop.f32.mrf.mxu0 }
 0x7c7   : > { %v1558_v51 = vadd.f32 %v1947_v48, %v1557_v49 }
 0x7c8   : > { %v2068_v50 = vpop.f32.mrf.mxu0 }
 0x7c9   : > { %v1564_v55 = vmax.f32 %v1558_v51, 0.0 }
 0x7ca   : > { %v1560_v52 = vpop.f32.mrf.mxu0 }
 0x7cb   : > { %v1561_v53 = vadd.f32 %v1947_v48, %v1560_v52 }
 0x7cc   : > { %v2069_v54 = vpop.f32.mrf.mxu0 }
 0x7cd   : > { %v1565_v56 = vmax.f32 %v1561_v53, 0.0 }
 0x7cf   : > { %v1566_v57 = vpack.c.bf16 %v1565_v56, %v1564_v55 }
 0x7d1   : > { %2079 = vmatmul.mubr.msk.bf16.vlgmr.msra.gmra.mxu1 %vm1606_vm11, %v1566_v57 }
 0x891   : > { %v1644_v58 = vpop.f32.mrf.mxu1 }
 0x892   : > { %v1645_v15 = vadd.f32 %v1951_v3, %v1644_v58 }
 0x893   : > { %v2080_v59 = vpop.f32.mrf.mxu1 }
 0x894   : > { %v1651_v60 = vadd.f32 %v1645_v15, %v1494_v42 }
 0x895   : > { %v1647_v61 = vpop.f32.mrf.mxu1 }
 0x896   : > { %v1648_v62 = vadd.f32 %v1951_v3, %v1647_v61  ;;  %v1653_v63 = vsel %vm773_vm3, %v1651_v60, 0.0 }
 0x897   : > { %1654 = vadd.xlane.f32.xlu1 %v1653_v63  ;;  %v2081_v0 = vpop.f32.mrf.mxu1 }
 0x898   : > { %v1652_v1 = vadd.f32 %v1648_v62, %v1495_v43 }
 0x89a   : > { %v1656_v2 = vsel %vm1441_vm10, %v1652_v1, 0.0 }
 0x89b   : > { %1657 = vadd.xlane.f32.xlu0 %v1656_v2 }
 0x920   : > { %v1655_v4 = vpop.xlane.xlu1 %1654 }
 0x921   : > { %v1659_v7 = vmul.f32 0.03125, %v1655_v4 }
 0x923   : > { %v1661_v8 = vsub.f32 %v1651_v60, %v1659_v7 }
 0x924   : > { %v1658_v9 = vpop.xlane.xlu0 %1657 }
 0x925   : > { %v1660_v10 = vmul.f32 0.03125, %v1658_v9  ;;  %v1663_v5 = vmul.f32 %v1661_v8, %v1661_v8 }
 0x927   : > { %v1662_v11 = vsub.f32 %v1652_v1, %v1660_v10  ;;  %v1665_v12 = vsel %vm773_vm3, %v1663_v5, 0.0 }
 0x928   : > { %1666 = vadd.xlane.f32.xlu1 %v1665_v12 }
 0x929   : > { %v1664_v13 = vmul.f32 %v1662_v11, %v1662_v11 }
 0x92b   : > { %v1668_v14 = vsel %vm1441_vm10, %v1664_v13, 0.0 }
 0x92c   : > { %1669 = vadd.xlane.f32.xlu1 %v1668_v14 }
 0x9b1   : > { %v1667_v16 = vpop.xlane.xlu1 %1666 }
 0x9b2   : > { %v1671_v17 = vmul.f32 0.03125, %v1667_v16 }
 0x9b4   : > { %v1673_v6 = vadd.f32 1e-05, %v1671_v17 }
 0x9b5   : > { %v1670_v18 = vpop.xlane.xlu1 %1669 }
 0x9b6   : > { %2202 = vrsqrt.f32 %v1673_v6  ;;  %v1672_v19 = vmul.f32 0.03125, %v1670_v18 }
 0x9b8   : > { %v1674_v20 = vadd.f32 1e-05, %v1672_v19 }
 0x9ba   : > { %2204 = vrsqrt.f32 %v1674_v20 }
 0x9c3   : > { %v2203_v21 = vpop.eup %2202 }
 0x9c4   : > { %v1677_v23 = vmul.f32 %v2203_v21, %v1661_v8 }
 0x9c6   : > { %v1686_v25 = vmul.f32 %v1957_v22, %v1677_v23 }
 0x9c7   : > { %v2205_v26 = vpop.eup %2204 }
 0x9c8   : > { %v1695_v27 = vadd.f32 %v1958_v24, %v1686_v25  ;;  %v1678_v28 = vmul.f32 %v2205_v26, %v1662_v11 }
 0x9ca   : > { %v1697_v29 = vmul.f32 %v1695_v27, %v2610_v39  ;;  %v1687_v30 = vmul.f32 %v1957_v22, %v1678_v28 }
 0x9cc   : > { %1699 = vst.msk [vmem:[%s2449_s10] sm:$0xff] %vm773_vm3, %v1697_v29  ;;  %v1696_v31 = vadd.f32 %v1958_v24, %v1687_v30 }
 0x9ce   : > { %v1698_v32 = vmul.f32 %v1696_v31, %v2612_v40 }
 0x9d0   : > { %1700 = vst.msk [vmem:[%s2449_s10 + $0x8] sm:$0x3] %vm1441_vm10, %v1698_v32 }
 0x9d1 PF: > { %s2730_s15 = sld [smem:[#allocation5_spill]] }
 0x9d2   : > { %s2731_s18 = sld [smem:[#allocation3_spill]] }
 0x9d3   : > { %s2732_s19 = sld [smem:[#allocation4_spill]] }
 0x9d4   : > { %s2733_s20 = sld [smem:[#allocation6_spill]] }
 0x9d5   : > { %s2734_s21 = sld [smem:[#allocation7_spill]] }
 0x9d7   : > { %s25_s22 = sadd.s32 1, %s2730_s15  }
 0x9d8   : > { %p22_p8 = scmp.ge.s32.totalorder %s25_s22, 6  }
 0x9da   :  { %24 = sbr.rel (!%p22_p8) target bundleno = 12 (0xc), region = 156 }

</bundles_post_ra>
